<compile_context>
chip_gen: v7x
topology: tpu7x:2x2x1
jax: 0.10.0
libtpu: 0.0.40
codegen_flags: <defaults>
</compile_context>

<pallas_src>
from functools import partial

import jax
import jax.numpy as jnp
from jax.experimental import pallas as pl
from jax.experimental.pallas import tpu as pltpu

_LANE = 128      # f32 lane width
_SUBLANE = 8     # f32 sublane width


# ------------------------------ fused kernel --------------------------------

def _make_fused_kernel(seq_len, batch_p, hidden, layers):
    """Build the fused (LSTM stack + FC) kernel for static shapes."""
    T, Bp, H = seq_len, batch_p, hidden

    def kernel(*refs):
        # refs = [x2, (wih_t, whh_t, b) * layers, w_fc, b_fc, out]
        x_ref = refs[0]
        lstm_refs = refs[1:1 + 3 * layers]
        wfc_ref = refs[1 + 3 * layers]
        bfc_ref = refs[2 + 3 * layers]
        out_ref = refs[3 + 3 * layers]

        wih = [lstm_refs[3 * l][...] for l in range(layers)]      # (D_in, 4H)
        whh = [lstm_refs[3 * l + 1][...] for l in range(layers)]  # (H,   4H)
        bias = [lstm_refs[3 * l + 2][...] for l in range(layers)] # (1,   4H)

        # Hoisted layer-0 input->gates matmul + bias: off the serial chain,
        # M = T*Bp rows for good MXU utilization.
        xg0 = jnp.dot(x_ref[...], wih[0],
                      preferred_element_type=jnp.float32) + bias[0]  # (T*Bp, 4H)

        h = [jnp.zeros((Bp, H), jnp.float32) for _ in range(layers)]
        c = [jnp.zeros((Bp, H), jnp.float32) for _ in range(layers)]

        # Wavefront schedule: stage s runs layer l at timestep t = s - l.
        # Layer l at stage s needs layer (l-1)'s hidden from stage s-1, so all
        # reads go through the per-stage snapshot `prev_h`.
        for s in range(T + layers - 1):
            prev_h = list(h)                     # previous-stage values
            for l in range(layers):
                t = s - l
                if not (0 <= t < T):
                    continue
                if l == 0:
                    # Static, 8-row-aligned slice of xg0: one (8,128) tile.
                    pre = xg0[t * Bp:(t + 1) * Bp, :]
                else:
                    pre = jnp.dot(prev_h[l - 1], wih[l],
                                  preferred_element_type=jnp.float32) + bias[l]
                gates = pre + jnp.dot(prev_h[l], whh[l],
                                      preferred_element_type=jnp.float32)  # (Bp,4H)
                # Full-width transcendentals (one sigmoid + one tanh per tile),
                # then cheap static 32-lane chunk selects for the combine.
                sig = jax.nn.sigmoid(gates)
                th = jnp.tanh(gates)
                # Prepared gate-column order is [f, i, g, o] (f lane-aligned
                # with c so f*c needs no XLU rotate on the recurrence chain).
                f_g = sig[:, 0 * H:1 * H]
                i_g = sig[:, 1 * H:2 * H]
                g_g = th[:, 2 * H:3 * H]
                o_g = sig[:, 3 * H:4 * H]
                c[l] = f_g * c[l] + i_g * g_g
                h[l] = o_g * jnp.tanh(c[l])

        # FC head on the final layer's last hidden state, lane-dense store.
        out_ref[...] = (
            jnp.dot(h[layers - 1], wfc_ref[...],
                    preferred_element_type=jnp.float32) + bfc_ref[...]
        )

    return kernel


# ------------------------------ JAX wrapper ----------------------------------

@partial(jax.jit, static_argnames=("out_dim",))
def net_forward(x_btd, prep, *, out_dim):
    """Forward pass matching Net.forward; x_btd is (B, T, input_dim).

    `prep` must come from prepare_params() (kernel-ready layouts, built once
    outside this jitted per-call path).
    """
    B, T, D = x_btd.shape
    lstm = prep["lstm"]
    layers = len(lstm)
    H = lstm[0]["whh_t"].shape[0]
    Op = prep["fc_w"].shape[1]
    Bp = ((B + _SUBLANE - 1) // _SUBLANE) * _SUBLANE      # sublane-padded batch

    # Per-call glue (data-dependent, cannot be hoisted): time-major, pad batch,
    # flatten to 2D for the hoisted layer-0 matmul.
    x = jnp.transpose(x_btd, (1, 0, 2)).astype(jnp.float32)   # (T, B, D)
    x = jnp.pad(x, ((0, 0), (0, Bp - B), (0, 0)))              # (T, Bp, D)
    x2 = x.reshape(T * Bp, D)                                  # (T*Bp, D)

    args = [x2]
    for lp in lstm:
        args += [lp["wih_t"], lp["whh_t"], lp["b"]]
    args += [prep["fc_w"], prep["fc_b"]]

    kernel = _make_fused_kernel(T, Bp, H, layers)
    out_pad = pl.pallas_call(
        kernel,
        out_shape=jax.ShapeDtypeStruct((Bp, Op), jnp.float32),
    )(*args)
    return out_pad[:B, :out_dim]


# --------------------------- parameter construction --------------------------

def init_params(key, input_dim, hidden_dim, output_dim, layers):
    """PyTorch-layout params; init mimics U(-1/sqrt(H), 1/sqrt(H))."""
    bound = 1.0 / (hidden_dim ** 0.5)
    lstm = []
    for layer in range(layers):
        d_in = input_dim if layer == 0 else hidden_dim
        key, k1, k2, k3, k4 = jax.random.split(key, 5)
        lstm.append({
            # PyTorch nn.LSTM layout: rows are gate blocks in order [i, f, g, o].
            "w_ih": jax.random.uniform(k1, (4 * hidden_dim, d_in), jnp.float32,
                                       -bound, bound),
            "w_hh": jax.random.uniform(k2, (4 * hidden_dim, hidden_dim),
                                       jnp.float32, -bound, bound),
            "b_ih": jax.random.uniform(k3, (4 * hidden_dim,), jnp.float32,
                                       -bound, bound),
            "b_hh": jax.random.uniform(k4, (4 * hidden_dim,), jnp.float32,
                                       -bound, bound),
        })
    key, k1, k2 = jax.random.split(key, 3)
    fc = {
        "w": jax.random.uniform(k1, (output_dim, hidden_dim), jnp.float32,
                                -bound, bound),
        "b": jax.random.uniform(k2, (output_dim,), jnp.float32, -bound, bound),
    }
    return {"lstm": lstm, "fc": fc}


def _permute_gate_blocks(w):
    """Reorder the 4 H-sized blocks along axis 0 from PyTorch's [i, f, g, o]
    to the kernel's [f, i, g, o] (f lane-aligned with c)."""
    H = w.shape[0] // 4
    i, f, g, o = (w[k * H:(k + 1) * H] for k in range(4))
    return jnp.concatenate([f, i, g, o], axis=0)


def prepare_params(raw):
    """One-time kernel-layout prep (run OUTSIDE the jitted forward path).

    NOTE: this assumes PyTorch's (i, f, g, o) gate-block order in w_ih / w_hh /
    biases; the kernel's [0:H]/[H:2H]/... slicing relies on the permutation
    applied here. Folds b = b_ih + b_hh and pads the FC head to 128 lanes.
    """
    lstm = []
    for lp in raw["lstm"]:
        wih_t = _permute_gate_blocks(lp["w_ih"]).T.astype(jnp.float32)  # (d_in,4H)
        whh_t = _permute_gate_blocks(lp["w_hh"]).T.astype(jnp.float32)  # (H,  4H)
        b = _permute_gate_blocks(lp["b_ih"] + lp["b_hh"]).reshape(1, -1)
        lstm.append({"wih_t": wih_t, "whh_t": whh_t,
                     "b": b.astype(jnp.float32)})
    O, H = raw["fc"]["w"].shape
    Op = ((O + _LANE - 1) // _LANE) * _LANE
    w_fc = jnp.pad(raw["fc"]["w"].T.astype(jnp.float32),
                   ((0, 0), (0, Op - O)))                    # (H, Op) lane-dense
    b_fc = jnp.pad(raw["fc"]["b"].reshape(1, -1).astype(jnp.float32),
                   ((0, 0), (0, Op - O)))                    # (1, Op)
    return {"lstm": lstm, "fc_w": w_fc, "fc_b": b_fc}


# ----------------------------- pure-JAX reference ----------------------------

def net_forward_ref(x_btd, raw):
    """Reference using the raw PyTorch-layout params and PyTorch gate order."""
    x = jnp.transpose(x_btd, (1, 0, 2)).astype(jnp.float32)   # (T, B, D)
    T, B, _ = x.shape
    for lp in raw["lstm"]:
        H = lp["w_hh"].shape[1]
        wih_t = lp["w_ih"].T
        whh_t = lp["w_hh"].T
        b = (lp["b_ih"] + lp["b_hh"]).reshape(1, -1)
        h = jnp.zeros((B, H), jnp.float32)
        c = jnp.zeros((B, H), jnp.float32)
        outs = []
        for t in range(T):
            gates = x[t] @ wih_t + h @ whh_t + b
            i_g = jax.nn.sigmoid(gates[:, 0 * H:1 * H])
            f_g = jax.nn.sigmoid(gates[:, 1 * H:2 * H])
            g_g = jnp.tanh(gates[:, 2 * H:3 * H])
            o_g = jax.nn.sigmoid(gates[:, 3 * H:4 * H])
            c = f_g * c + i_g * g_g
            h = o_g * jnp.tanh(c)
            outs.append(h)
        x = jnp.stack(outs, axis=0)
    return x[-1] @ raw["fc"]["w"].T + raw["fc"]["b"]


# ------------------------------------ main ------------------------------------

if __name__ == "__main__":
    INPUT_DIM = 8
    HIDDEN_DIM = 32
    SEQ_LEN = 8
    OUTPUT_DIM = 4
    LAYERS = 2
    BATCH = 2

    key = jax.random.PRNGKey(0)
    key, kx, kp = jax.random.split(key, 3)
    x = jax.random.normal(kx, (BATCH, SEQ_LEN, INPUT_DIM), jnp.float32)
    raw_params = init_params(kp, INPUT_DIM, HIDDEN_DIM, OUTPUT_DIM, LAYERS)
    prep = prepare_params(raw_params)       # one-time layout prep, outside jit

    out = jax.block_until_ready(net_forward(x, prep, out_dim=OUTPUT_DIM))
    assert out.shape == (BATCH, OUTPUT_DIM), out.shape

    ref = net_forward_ref(x, raw_params)
    assert jnp.allclose(out, ref, rtol=1e-3, atol=1e-3), (out, ref)

    print("KERNEL_OK")
</pallas_src>

<mosaic_0001>
module attributes {stable_mosaic.version = 11 : i64} {
  func.func @kernel(%arg0: memref<64x8xf32, #tpu.memory_space<vmem>>, %arg1: memref<8x128xf32, #tpu.memory_space<vmem>>, %arg2: memref<32x128xf32, #tpu.memory_space<vmem>>, %arg3: memref<1x128xf32, #tpu.memory_space<vmem>>, %arg4: memref<32x128xf32, #tpu.memory_space<vmem>>, %arg5: memref<32x128xf32, #tpu.memory_space<vmem>>, %arg6: memref<1x128xf32, #tpu.memory_space<vmem>>, %arg7: memref<32x128xf32, #tpu.memory_space<vmem>>, %arg8: memref<1x128xf32, #tpu.memory_space<vmem>>, %arg9: memref<8x128xf32, #tpu.memory_space<vmem>>) attributes {dimension_semantics = [], scalar_prefetch = 0 : i64, scratch_operands = 0 : i64, tpu.core_type = #tpu.core_type<tc>} {
    %c0 = arith.constant 0 : index
    %c0_0 = arith.constant 0 : index
    %0 = vector.load %arg1[%c0, %c0_0] : memref<8x128xf32, #tpu.memory_space<vmem>>, vector<8x128xf32>
    %c0_1 = arith.constant 0 : index
    %c0_2 = arith.constant 0 : index
    %1 = vector.load %arg4[%c0_1, %c0_2] : memref<32x128xf32, #tpu.memory_space<vmem>>, vector<32x128xf32>
    %c0_3 = arith.constant 0 : index
    %c0_4 = arith.constant 0 : index
    %2 = vector.load %arg2[%c0_3, %c0_4] : memref<32x128xf32, #tpu.memory_space<vmem>>, vector<32x128xf32>
    %c0_5 = arith.constant 0 : index
    %c0_6 = arith.constant 0 : index
    %3 = vector.load %arg5[%c0_5, %c0_6] : memref<32x128xf32, #tpu.memory_space<vmem>>, vector<32x128xf32>
    %c0_7 = arith.constant 0 : index
    %c0_8 = arith.constant 0 : index
    %4 = vector.load %arg3[%c0_7, %c0_8] : memref<1x128xf32, #tpu.memory_space<vmem>>, vector<1x128xf32>
    %c0_9 = arith.constant 0 : index
    %c0_10 = arith.constant 0 : index
    %5 = vector.load %arg6[%c0_9, %c0_10] : memref<1x128xf32, #tpu.memory_space<vmem>>, vector<1x128xf32>
    %c0_11 = arith.constant 0 : index
    %c0_12 = arith.constant 0 : index
    %6 = vector.load %arg0[%c0_11, %c0_12] : memref<64x8xf32, #tpu.memory_space<vmem>>, vector<64x8xf32>
    %cst = arith.constant dense<0.000000e+00> : vector<64x128xf32>
    %7 = tpu.matmul %6, %0, %cst {dimension_numbers = #tpu.dot_dimension_numbers<[1], [0], [0], [1], [0, 0, 1, 1], [], []>} : vector<64x8xf32>, vector<8x128xf32>, vector<64x128xf32> -> vector<64x128xf32>
    %8 = vector.broadcast %4 : vector<1x128xf32> to vector<64x128xf32>
    %9 = arith.addf %7, %8 : vector<64x128xf32>
    %cst_13 = arith.constant 0.000000e+00 : f32
    %10 = vector.broadcast %cst_13 : f32 to vector<8x32xf32>
    %cst_14 = arith.constant 0.000000e+00 : f32
    %11 = vector.broadcast %cst_14 : f32 to vector<8x32xf32>
    %cst_15 = arith.constant 0.000000e+00 : f32
    %12 = vector.broadcast %cst_15 : f32 to vector<8x32xf32>
    %cst_16 = arith.constant 0.000000e+00 : f32
    %13 = vector.broadcast %cst_16 : f32 to vector<8x32xf32>
    %14 = vector.extract_strided_slice %9 {offsets = [0, 0], sizes = [8, 128], strides = [1, 1]} : vector<64x128xf32> to vector<8x128xf32>
    %cst_17 = arith.constant dense<0.000000e+00> : vector<8x128xf32>
    %15 = tpu.matmul %10, %2, %cst_17 {dimension_numbers = #tpu.dot_dimension_numbers<[1], [0], [0], [1], [0, 0, 1, 1], [], []>} : vector<8x32xf32>, vector<32x128xf32>, vector<8x128xf32> -> vector<8x128xf32>
    %16 = arith.addf %14, %15 : vector<8x128xf32>
    %17 = arith.negf %16 : vector<8x128xf32>
    %18 = math.exp %17 : vector<8x128xf32>
    %cst_18 = arith.constant 1.000000e+00 : f32
    %19 = vector.broadcast %cst_18 : f32 to vector<8x128xf32>
    %20 = arith.addf %19, %18 : vector<8x128xf32>
    %21 = arith.divf %19, %20 : vector<8x128xf32>
    %22 = math.tanh %16 : vector<8x128xf32>
    %23 = vector.extract_strided_slice %21 {offsets = [0, 0], sizes = [8, 32], strides = [1, 1]} : vector<8x128xf32> to vector<8x32xf32>
    %24 = vector.extract_strided_slice %21 {offsets = [0, 32], sizes = [8, 32], strides = [1, 1]} : vector<8x128xf32> to vector<8x32xf32>
    %25 = vector.extract_strided_slice %22 {offsets = [0, 64], sizes = [8, 32], strides = [1, 1]} : vector<8x128xf32> to vector<8x32xf32>
    %26 = vector.extract_strided_slice %21 {offsets = [0, 96], sizes = [8, 32], strides = [1, 1]} : vector<8x128xf32> to vector<8x32xf32>
    %27 = arith.mulf %23, %12 : vector<8x32xf32>
    %28 = arith.mulf %24, %25 : vector<8x32xf32>
    %29 = arith.addf %27, %28 : vector<8x32xf32>
    %30 = math.tanh %29 : vector<8x32xf32>
    %31 = arith.mulf %26, %30 : vector<8x32xf32>
    %32 = vector.extract_strided_slice %9 {offsets = [8, 0], sizes = [8, 128], strides = [1, 1]} : vector<64x128xf32> to vector<8x128xf32>
    %cst_19 = arith.constant dense<0.000000e+00> : vector<8x128xf32>
    %33 = tpu.matmul %31, %2, %cst_19 {dimension_numbers = #tpu.dot_dimension_numbers<[1], [0], [0], [1], [0, 0, 1, 1], [], []>} : vector<8x32xf32>, vector<32x128xf32>, vector<8x128xf32> -> vector<8x128xf32>
    %34 = arith.addf %32, %33 : vector<8x128xf32>
    %35 = arith.negf %34 : vector<8x128xf32>
    %36 = math.exp %35 : vector<8x128xf32>
    %cst_20 = arith.constant 1.000000e+00 : f32
    %37 = vector.broadcast %cst_20 : f32 to vector<8x128xf32>
    %38 = arith.addf %37, %36 : vector<8x128xf32>
    %39 = arith.divf %37, %38 : vector<8x128xf32>
    %40 = math.tanh %34 : vector<8x128xf32>
    %41 = vector.extract_strided_slice %39 {offsets = [0, 0], sizes = [8, 32], strides = [1, 1]} : vector<8x128xf32> to vector<8x32xf32>
    %42 = vector.extract_strided_slice %39 {offsets = [0, 32], sizes = [8, 32], strides = [1, 1]} : vector<8x128xf32> to vector<8x32xf32>
    %43 = vector.extract_strided_slice %40 {offsets = [0, 64], sizes = [8, 32], strides = [1, 1]} : vector<8x128xf32> to vector<8x32xf32>
    %44 = vector.extract_strided_slice %39 {offsets = [0, 96], sizes = [8, 32], strides = [1, 1]} : vector<8x128xf32> to vector<8x32xf32>
    %45 = arith.mulf %41, %29 : vector<8x32xf32>
    %46 = arith.mulf %42, %43 : vector<8x32xf32>
    %47 = arith.addf %45, %46 : vector<8x32xf32>
    %48 = math.tanh %47 : vector<8x32xf32>
    %49 = arith.mulf %44, %48 : vector<8x32xf32>
    %cst_21 = arith.constant dense<0.000000e+00> : vector<8x128xf32>
    %50 = tpu.matmul %31, %1, %cst_21 {dimension_numbers = #tpu.dot_dimension_numbers<[1], [0], [0], [1], [0, 0, 1, 1], [], []>} : vector<8x32xf32>, vector<32x128xf32>, vector<8x128xf32> -> vector<8x128xf32>
    %51 = vector.broadcast %5 : vector<1x128xf32> to vector<8x128xf32>
    %52 = arith.addf %50, %51 : vector<8x128xf32>
    %cst_22 = arith.constant dense<0.000000e+00> : vector<8x128xf32>
    %53 = tpu.matmul %11, %3, %cst_22 {dimension_numbers = #tpu.dot_dimension_numbers<[1], [0], [0], [1], [0, 0, 1, 1], [], []>} : vector<8x32xf32>, vector<32x128xf32>, vector<8x128xf32> -> vector<8x128xf32>
    %54 = arith.addf %52, %53 : vector<8x128xf32>
    %55 = arith.negf %54 : vector<8x128xf32>
    %56 = math.exp %55 : vector<8x128xf32>
    %cst_23 = arith.constant 1.000000e+00 : f32
    %57 = vector.broadcast %cst_23 : f32 to vector<8x128xf32>
    %58 = arith.addf %57, %56 : vector<8x128xf32>
    %59 = arith.divf %57, %58 : vector<8x128xf32>
    %60 = math.tanh %54 : vector<8x128xf32>
    %61 = vector.extract_strided_slice %59 {offsets = [0, 0], sizes = [8, 32], strides = [1, 1]} : vector<8x128xf32> to vector<8x32xf32>
    %62 = vector.extract_strided_slice %59 {offsets = [0, 32], sizes = [8, 32], strides = [1, 1]} : vector<8x128xf32> to vector<8x32xf32>
    %63 = vector.extract_strided_slice %60 {offsets = [0, 64], sizes = [8, 32], strides = [1, 1]} : vector<8x128xf32> to vector<8x32xf32>
    %64 = vector.extract_strided_slice %59 {offsets = [0, 96], sizes = [8, 32], strides = [1, 1]} : vector<8x128xf32> to vector<8x32xf32>
    %65 = arith.mulf %61, %13 : vector<8x32xf32>
    %66 = arith.mulf %62, %63 : vector<8x32xf32>
    %67 = arith.addf %65, %66 : vector<8x32xf32>
    %68 = math.tanh %67 : vector<8x32xf32>
    %69 = arith.mulf %64, %68 : vector<8x32xf32>
    %70 = vector.extract_strided_slice %9 {offsets = [16, 0], sizes = [8, 128], strides = [1, 1]} : vector<64x128xf32> to vector<8x128xf32>
    %cst_24 = arith.constant dense<0.000000e+00> : vector<8x128xf32>
    %71 = tpu.matmul %49, %2, %cst_24 {dimension_numbers = #tpu.dot_dimension_numbers<[1], [0], [0], [1], [0, 0, 1, 1], [], []>} : vector<8x32xf32>, vector<32x128xf32>, vector<8x128xf32> -> vector<8x128xf32>
    %72 = arith.addf %70, %71 : vector<8x128xf32>
    %73 = arith.negf %72 : vector<8x128xf32>
    %74 = math.exp %73 : vector<8x128xf32>
    %cst_25 = arith.constant 1.000000e+00 : f32
    %75 = vector.broadcast %cst_25 : f32 to vector<8x128xf32>
    %76 = arith.addf %75, %74 : vector<8x128xf32>
    %77 = arith.divf %75, %76 : vector<8x128xf32>
    %78 = math.tanh %72 : vector<8x128xf32>
    %79 = vector.extract_strided_slice %77 {offsets = [0, 0], sizes = [8, 32], strides = [1, 1]} : vector<8x128xf32> to vector<8x32xf32>
    %80 = vector.extract_strided_slice %77 {offsets = [0, 32], sizes = [8, 32], strides = [1, 1]} : vector<8x128xf32> to vector<8x32xf32>
    %81 = vector.extract_strided_slice %78 {offsets = [0, 64], sizes = [8, 32], strides = [1, 1]} : vector<8x128xf32> to vector<8x32xf32>
    %82 = vector.extract_strided_slice %77 {offsets = [0, 96], sizes = [8, 32], strides = [1, 1]} : vector<8x128xf32> to vector<8x32xf32>
    %83 = arith.mulf %79, %47 : vector<8x32xf32>
    %84 = arith.mulf %80, %81 : vector<8x32xf32>
    %85 = arith.addf %83, %84 : vector<8x32xf32>
    %86 = math.tanh %85 : vector<8x32xf32>
    %87 = arith.mulf %82, %86 : vector<8x32xf32>
    %cst_26 = arith.constant dense<0.000000e+00> : vector<8x128xf32>
    %88 = tpu.matmul %49, %1, %cst_26 {dimension_numbers = #tpu.dot_dimension_numbers<[1], [0], [0], [1], [0, 0, 1, 1], [], []>} : vector<8x32xf32>, vector<32x128xf32>, vector<8x128xf32> -> vector<8x128xf32>
    %89 = vector.broadcast %5 : vector<1x128xf32> to vector<8x128xf32>
    %90 = arith.addf %88, %89 : vector<8x128xf32>
    %cst_27 = arith.constant dense<0.000000e+00> : vector<8x128xf32>
    %91 = tpu.matmul %69, %3, %cst_27 {dimension_numbers = #tpu.dot_dimension_numbers<[1], [0], [0], [1], [0, 0, 1, 1], [], []>} : vector<8x32xf32>, vector<32x128xf32>, vector<8x128xf32> -> vector<8x128xf32>
    %92 = arith.addf %90, %91 : vector<8x128xf32>
    %93 = arith.negf %92 : vector<8x128xf32>
    %94 = math.exp %93 : vector<8x128xf32>
    %cst_28 = arith.constant 1.000000e+00 : f32
    %95 = vector.broadcast %cst_28 : f32 to vector<8x128xf32>
    %96 = arith.addf %95, %94 : vector<8x128xf32>
    %97 = arith.divf %95, %96 : vector<8x128xf32>
    %98 = math.tanh %92 : vector<8x128xf32>
    %99 = vector.extract_strided_slice %97 {offsets = [0, 0], sizes = [8, 32], strides = [1, 1]} : vector<8x128xf32> to vector<8x32xf32>
    %100 = vector.extract_strided_slice %97 {offsets = [0, 32], sizes = [8, 32], strides = [1, 1]} : vector<8x128xf32> to vector<8x32xf32>
    %101 = vector.extract_strided_slice %98 {offsets = [0, 64], sizes = [8, 32], strides = [1, 1]} : vector<8x128xf32> to vector<8x32xf32>
    %102 = vector.extract_strided_slice %97 {offsets = [0, 96], sizes = [8, 32], strides = [1, 1]} : vector<8x128xf32> to vector<8x32xf32>
    %103 = arith.mulf %99, %67 : vector<8x32xf32>
    %104 = arith.mulf %100, %101 : vector<8x32xf32>
    %105 = arith.addf %103, %104 : vector<8x32xf32>
    %106 = math.tanh %105 : vector<8x32xf32>
    %107 = arith.mulf %102, %106 : vector<8x32xf32>
    %108 = vector.extract_strided_slice %9 {offsets = [24, 0], sizes = [8, 128], strides = [1, 1]} : vector<64x128xf32> to vector<8x128xf32>
    %cst_29 = arith.constant dense<0.000000e+00> : vector<8x128xf32>
    %109 = tpu.matmul %87, %2, %cst_29 {dimension_numbers = #tpu.dot_dimension_numbers<[1], [0], [0], [1], [0, 0, 1, 1], [], []>} : vector<8x32xf32>, vector<32x128xf32>, vector<8x128xf32> -> vector<8x128xf32>
    %110 = arith.addf %108, %109 : vector<8x128xf32>
    %111 = arith.negf %110 : vector<8x128xf32>
    %112 = math.exp %111 : vector<8x128xf32>
    %cst_30 = arith.constant 1.000000e+00 : f32
    %113 = vector.broadcast %cst_30 : f32 to vector<8x128xf32>
    %114 = arith.addf %113, %112 : vector<8x128xf32>
    %115 = arith.divf %113, %114 : vector<8x128xf32>
    %116 = math.tanh %110 : vector<8x128xf32>
    %117 = vector.extract_strided_slice %115 {offsets = [0, 0], sizes = [8, 32], strides = [1, 1]} : vector<8x128xf32> to vector<8x32xf32>
    %118 = vector.extract_strided_slice %115 {offsets = [0, 32], sizes = [8, 32], strides = [1, 1]} : vector<8x128xf32> to vector<8x32xf32>
    %119 = vector.extract_strided_slice %116 {offsets = [0, 64], sizes = [8, 32], strides = [1, 1]} : vector<8x128xf32> to vector<8x32xf32>
    %120 = vector.extract_strided_slice %115 {offsets = [0, 96], sizes = [8, 32], strides = [1, 1]} : vector<8x128xf32> to vector<8x32xf32>
    %121 = arith.mulf %117, %85 : vector<8x32xf32>
    %122 = arith.mulf %118, %119 : vector<8x32xf32>
    %123 = arith.addf %121, %122 : vector<8x32xf32>
    %124 = math.tanh %123 : vector<8x32xf32>
    %125 = arith.mulf %120, %124 : vector<8x32xf32>
    %cst_31 = arith.constant dense<0.000000e+00> : vector<8x128xf32>
    %126 = tpu.matmul %87, %1, %cst_31 {dimension_numbers = #tpu.dot_dimension_numbers<[1], [0], [0], [1], [0, 0, 1, 1], [], []>} : vector<8x32xf32>, vector<32x128xf32>, vector<8x128xf32> -> vector<8x128xf32>
    %127 = vector.broadcast %5 : vector<1x128xf32> to vector<8x128xf32>
    %128 = arith.addf %126, %127 : vector<8x128xf32>
    %cst_32 = arith.constant dense<0.000000e+00> : vector<8x128xf32>
    %129 = tpu.matmul %107, %3, %cst_32 {dimension_numbers = #tpu.dot_dimension_numbers<[1], [0], [0], [1], [0, 0, 1, 1], [], []>} : vector<8x32xf32>, vector<32x128xf32>, vector<8x128xf32> -> vector<8x128xf32>
    %130 = arith.addf %128, %129 : vector<8x128xf32>
    %131 = arith.negf %130 : vector<8x128xf32>
    %132 = math.exp %131 : vector<8x128xf32>
    %cst_33 = arith.constant 1.000000e+00 : f32
    %133 = vector.broadcast %cst_33 : f32 to vector<8x128xf32>
    %134 = arith.addf %133, %132 : vector<8x128xf32>
    %135 = arith.divf %133, %134 : vector<8x128xf32>
    %136 = math.tanh %130 : vector<8x128xf32>
    %137 = vector.extract_strided_slice %135 {offsets = [0, 0], sizes = [8, 32], strides = [1, 1]} : vector<8x128xf32> to vector<8x32xf32>
    %138 = vector.extract_strided_slice %135 {offsets = [0, 32], sizes = [8, 32], strides = [1, 1]} : vector<8x128xf32> to vector<8x32xf32>
    %139 = vector.extract_strided_slice %136 {offsets = [0, 64], sizes = [8, 32], strides = [1, 1]} : vector<8x128xf32> to vector<8x32xf32>
    %140 = vector.extract_strided_slice %135 {offsets = [0, 96], sizes = [8, 32], strides = [1, 1]} : vector<8x128xf32> to vector<8x32xf32>
    %141 = arith.mulf %137, %105 : vector<8x32xf32>
    %142 = arith.mulf %138, %139 : vector<8x32xf32>
    %143 = arith.addf %141, %142 : vector<8x32xf32>
    %144 = math.tanh %143 : vector<8x32xf32>
    %145 = arith.mulf %140, %144 : vector<8x32xf32>
    %146 = vector.extract_strided_slice %9 {offsets = [32, 0], sizes = [8, 128], strides = [1, 1]} : vector<64x128xf32> to vector<8x128xf32>
    %cst_34 = arith.constant dense<0.000000e+00> : vector<8x128xf32>
    %147 = tpu.matmul %125, %2, %cst_34 {dimension_numbers = #tpu.dot_dimension_numbers<[1], [0], [0], [1], [0, 0, 1, 1], [], []>} : vector<8x32xf32>, vector<32x128xf32>, vector<8x128xf32> -> vector<8x128xf32>
    %148 = arith.addf %146, %147 : vector<8x128xf32>
    %149 = arith.negf %148 : vector<8x128xf32>
    %150 = math.exp %149 : vector<8x128xf32>
    %cst_35 = arith.constant 1.000000e+00 : f32
    %151 = vector.broadcast %cst_35 : f32 to vector<8x128xf32>
    %152 = arith.addf %151, %150 : vector<8x128xf32>
    %153 = arith.divf %151, %152 : vector<8x128xf32>
    %154 = math.tanh %148 : vector<8x128xf32>
    %155 = vector.extract_strided_slice %153 {offsets = [0, 0], sizes = [8, 32], strides = [1, 1]} : vector<8x128xf32> to vector<8x32xf32>
    %156 = vector.extract_strided_slice %153 {offsets = [0, 32], sizes = [8, 32], strides = [1, 1]} : vector<8x128xf32> to vector<8x32xf32>
    %157 = vector.extract_strided_slice %154 {offsets = [0, 64], sizes = [8, 32], strides = [1, 1]} : vector<8x128xf32> to vector<8x32xf32>
    %158 = vector.extract_strided_slice %153 {offsets = [0, 96], sizes = [8, 32], strides = [1, 1]} : vector<8x128xf32> to vector<8x32xf32>
    %159 = arith.mulf %155, %123 : vector<8x32xf32>
    %160 = arith.mulf %156, %157 : vector<8x32xf32>
    %161 = arith.addf %159, %160 : vector<8x32xf32>
    %162 = math.tanh %161 : vector<8x32xf32>
    %163 = arith.mulf %158, %162 : vector<8x32xf32>
    %cst_36 = arith.constant dense<0.000000e+00> : vector<8x128xf32>
    %164 = tpu.matmul %125, %1, %cst_36 {dimension_numbers = #tpu.dot_dimension_numbers<[1], [0], [0], [1], [0, 0, 1, 1], [], []>} : vector<8x32xf32>, vector<32x128xf32>, vector<8x128xf32> -> vector<8x128xf32>
    %165 = vector.broadcast %5 : vector<1x128xf32> to vector<8x128xf32>
    %166 = arith.addf %164, %165 : vector<8x128xf32>
    %cst_37 = arith.constant dense<0.000000e+00> : vector<8x128xf32>
    %167 = tpu.matmul %145, %3, %cst_37 {dimension_numbers = #tpu.dot_dimension_numbers<[1], [0], [0], [1], [0, 0, 1, 1], [], []>} : vector<8x32xf32>, vector<32x128xf32>, vector<8x128xf32> -> vector<8x128xf32>
    %168 = arith.addf %166, %167 : vector<8x128xf32>
    %169 = arith.negf %168 : vector<8x128xf32>
    %170 = math.exp %169 : vector<8x128xf32>
    %cst_38 = arith.constant 1.000000e+00 : f32
    %171 = vector.broadcast %cst_38 : f32 to vector<8x128xf32>
    %172 = arith.addf %171, %170 : vector<8x128xf32>
    %173 = arith.divf %171, %172 : vector<8x128xf32>
    %174 = math.tanh %168 : vector<8x128xf32>
    %175 = vector.extract_strided_slice %173 {offsets = [0, 0], sizes = [8, 32], strides = [1, 1]} : vector<8x128xf32> to vector<8x32xf32>
    %176 = vector.extract_strided_slice %173 {offsets = [0, 32], sizes = [8, 32], strides = [1, 1]} : vector<8x128xf32> to vector<8x32xf32>
    %177 = vector.extract_strided_slice %174 {offsets = [0, 64], sizes = [8, 32], strides = [1, 1]} : vector<8x128xf32> to vector<8x32xf32>
    %178 = vector.extract_strided_slice %173 {offsets = [0, 96], sizes = [8, 32], strides = [1, 1]} : vector<8x128xf32> to vector<8x32xf32>
    %179 = arith.mulf %175, %143 : vector<8x32xf32>
    %180 = arith.mulf %176, %177 : vector<8x32xf32>
    %181 = arith.addf %179, %180 : vector<8x32xf32>
    %182 = math.tanh %181 : vector<8x32xf32>
    %183 = arith.mulf %178, %182 : vector<8x32xf32>
    %184 = vector.extract_strided_slice %9 {offsets = [40, 0], sizes = [8, 128], strides = [1, 1]} : vector<64x128xf32> to vector<8x128xf32>
    %cst_39 = arith.constant dense<0.000000e+00> : vector<8x128xf32>
    %185 = tpu.matmul %163, %2, %cst_39 {dimension_numbers = #tpu.dot_dimension_numbers<[1], [0], [0], [1], [0, 0, 1, 1], [], []>} : vector<8x32xf32>, vector<32x128xf32>, vector<8x128xf32> -> vector<8x128xf32>
    %186 = arith.addf %184, %185 : vector<8x128xf32>
    %187 = arith.negf %186 : vector<8x128xf32>
    %188 = math.exp %187 : vector<8x128xf32>
    %cst_40 = arith.constant 1.000000e+00 : f32
    %189 = vector.broadcast %cst_40 : f32 to vector<8x128xf32>
    %190 = arith.addf %189, %188 : vector<8x128xf32>
    %191 = arith.divf %189, %190 : vector<8x128xf32>
    %192 = math.tanh %186 : vector<8x128xf32>
    %193 = vector.extract_strided_slice %191 {offsets = [0, 0], sizes = [8, 32], strides = [1, 1]} : vector<8x128xf32> to vector<8x32xf32>
    %194 = vector.extract_strided_slice %191 {offsets = [0, 32], sizes = [8, 32], strides = [1, 1]} : vector<8x128xf32> to vector<8x32xf32>
    %195 = vector.extract_strided_slice %192 {offsets = [0, 64], sizes = [8, 32], strides = [1, 1]} : vector<8x128xf32> to vector<8x32xf32>
    %196 = vector.extract_strided_slice %191 {offsets = [0, 96], sizes = [8, 32], strides = [1, 1]} : vector<8x128xf32> to vector<8x32xf32>
    %197 = arith.mulf %193, %161 : vector<8x32xf32>
    %198 = arith.mulf %194, %195 : vector<8x32xf32>
    %199 = arith.addf %197, %198 : vector<8x32xf32>
    %200 = math.tanh %199 : vector<8x32xf32>
    %201 = arith.mulf %196, %200 : vector<8x32xf32>
    %cst_41 = arith.constant dense<0.000000e+00> : vector<8x128xf32>
    %202 = tpu.matmul %163, %1, %cst_41 {dimension_numbers = #tpu.dot_dimension_numbers<[1], [0], [0], [1], [0, 0, 1, 1], [], []>} : vector<8x32xf32>, vector<32x128xf32>, vector<8x128xf32> -> vector<8x128xf32>
    %203 = vector.broadcast %5 : vector<1x128xf32> to vector<8x128xf32>
    %204 = arith.addf %202, %203 : vector<8x128xf32>
    %cst_42 = arith.constant dense<0.000000e+00> : vector<8x128xf32>
    %205 = tpu.matmul %183, %3, %cst_42 {dimension_numbers = #tpu.dot_dimension_numbers<[1], [0], [0], [1], [0, 0, 1, 1], [], []>} : vector<8x32xf32>, vector<32x128xf32>, vector<8x128xf32> -> vector<8x128xf32>
    %206 = arith.addf %204, %205 : vector<8x128xf32>
    %207 = arith.negf %206 : vector<8x128xf32>
    %208 = math.exp %207 : vector<8x128xf32>
    %cst_43 = arith.constant 1.000000e+00 : f32
    %209 = vector.broadcast %cst_43 : f32 to vector<8x128xf32>
    %210 = arith.addf %209, %208 : vector<8x128xf32>
    %211 = arith.divf %209, %210 : vector<8x128xf32>
    %212 = math.tanh %206 : vector<8x128xf32>
    %213 = vector.extract_strided_slice %211 {offsets = [0, 0], sizes = [8, 32], strides = [1, 1]} : vector<8x128xf32> to vector<8x32xf32>
    %214 = vector.extract_strided_slice %211 {offsets = [0, 32], sizes = [8, 32], strides = [1, 1]} : vector<8x128xf32> to vector<8x32xf32>
    %215 = vector.extract_strided_slice %212 {offsets = [0, 64], sizes = [8, 32], strides = [1, 1]} : vector<8x128xf32> to vector<8x32xf32>
    %216 = vector.extract_strided_slice %211 {offsets = [0, 96], sizes = [8, 32], strides = [1, 1]} : vector<8x128xf32> to vector<8x32xf32>
    %217 = arith.mulf %213, %181 : vector<8x32xf32>
    %218 = arith.mulf %214, %215 : vector<8x32xf32>
    %219 = arith.addf %217, %218 : vector<8x32xf32>
    %220 = math.tanh %219 : vector<8x32xf32>
    %221 = arith.mulf %216, %220 : vector<8x32xf32>
    %222 = vector.extract_strided_slice %9 {offsets = [48, 0], sizes = [8, 128], strides = [1, 1]} : vector<64x128xf32> to vector<8x128xf32>
    %cst_44 = arith.constant dense<0.000000e+00> : vector<8x128xf32>
    %223 = tpu.matmul %201, %2, %cst_44 {dimension_numbers = #tpu.dot_dimension_numbers<[1], [0], [0], [1], [0, 0, 1, 1], [], []>} : vector<8x32xf32>, vector<32x128xf32>, vector<8x128xf32> -> vector<8x128xf32>
    %224 = arith.addf %222, %223 : vector<8x128xf32>
    %225 = arith.negf %224 : vector<8x128xf32>
    %226 = math.exp %225 : vector<8x128xf32>
    %cst_45 = arith.constant 1.000000e+00 : f32
    %227 = vector.broadcast %cst_45 : f32 to vector<8x128xf32>
    %228 = arith.addf %227, %226 : vector<8x128xf32>
    %229 = arith.divf %227, %228 : vector<8x128xf32>
    %230 = math.tanh %224 : vector<8x128xf32>
    %231 = vector.extract_strided_slice %229 {offsets = [0, 0], sizes = [8, 32], strides = [1, 1]} : vector<8x128xf32> to vector<8x32xf32>
    %232 = vector.extract_strided_slice %229 {offsets = [0, 32], sizes = [8, 32], strides = [1, 1]} : vector<8x128xf32> to vector<8x32xf32>
    %233 = vector.extract_strided_slice %230 {offsets = [0, 64], sizes = [8, 32], strides = [1, 1]} : vector<8x128xf32> to vector<8x32xf32>
    %234 = vector.extract_strided_slice %229 {offsets = [0, 96], sizes = [8, 32], strides = [1, 1]} : vector<8x128xf32> to vector<8x32xf32>
    %235 = arith.mulf %231, %199 : vector<8x32xf32>
    %236 = arith.mulf %232, %233 : vector<8x32xf32>
    %237 = arith.addf %235, %236 : vector<8x32xf32>
    %238 = math.tanh %237 : vector<8x32xf32>
    %239 = arith.mulf %234, %238 : vector<8x32xf32>
    %cst_46 = arith.constant dense<0.000000e+00> : vector<8x128xf32>
    %240 = tpu.matmul %201, %1, %cst_46 {dimension_numbers = #tpu.dot_dimension_numbers<[1], [0], [0], [1], [0, 0, 1, 1], [], []>} : vector<8x32xf32>, vector<32x128xf32>, vector<8x128xf32> -> vector<8x128xf32>
    %241 = vector.broadcast %5 : vector<1x128xf32> to vector<8x128xf32>
    %242 = arith.addf %240, %241 : vector<8x128xf32>
    %cst_47 = arith.constant dense<0.000000e+00> : vector<8x128xf32>
    %243 = tpu.matmul %221, %3, %cst_47 {dimension_numbers = #tpu.dot_dimension_numbers<[1], [0], [0], [1], [0, 0, 1, 1], [], []>} : vector<8x32xf32>, vector<32x128xf32>, vector<8x128xf32> -> vector<8x128xf32>
    %244 = arith.addf %242, %243 : vector<8x128xf32>
    %245 = arith.negf %244 : vector<8x128xf32>
    %246 = math.exp %245 : vector<8x128xf32>
    %cst_48 = arith.constant 1.000000e+00 : f32
    %247 = vector.broadcast %cst_48 : f32 to vector<8x128xf32>
    %248 = arith.addf %247, %246 : vector<8x128xf32>
    %249 = arith.divf %247, %248 : vector<8x128xf32>
    %250 = math.tanh %244 : vector<8x128xf32>
    %251 = vector.extract_strided_slice %249 {offsets = [0, 0], sizes = [8, 32], strides = [1, 1]} : vector<8x128xf32> to vector<8x32xf32>
    %252 = vector.extract_strided_slice %249 {offsets = [0, 32], sizes = [8, 32], strides = [1, 1]} : vector<8x128xf32> to vector<8x32xf32>
    %253 = vector.extract_strided_slice %250 {offsets = [0, 64], sizes = [8, 32], strides = [1, 1]} : vector<8x128xf32> to vector<8x32xf32>
    %254 = vector.extract_strided_slice %249 {offsets = [0, 96], sizes = [8, 32], strides = [1, 1]} : vector<8x128xf32> to vector<8x32xf32>
    %255 = arith.mulf %251, %219 : vector<8x32xf32>
    %256 = arith.mulf %252, %253 : vector<8x32xf32>
    %257 = arith.addf %255, %256 : vector<8x32xf32>
    %258 = math.tanh %257 : vector<8x32xf32>
    %259 = arith.mulf %254, %258 : vector<8x32xf32>
    %260 = vector.extract_strided_slice %9 {offsets = [56, 0], sizes = [8, 128], strides = [1, 1]} : vector<64x128xf32> to vector<8x128xf32>
    %cst_49 = arith.constant dense<0.000000e+00> : vector<8x128xf32>
    %261 = tpu.matmul %239, %2, %cst_49 {dimension_numbers = #tpu.dot_dimension_numbers<[1], [0], [0], [1], [0, 0, 1, 1], [], []>} : vector<8x32xf32>, vector<32x128xf32>, vector<8x128xf32> -> vector<8x128xf32>
    %262 = arith.addf %260, %261 : vector<8x128xf32>
    %263 = arith.negf %262 : vector<8x128xf32>
    %264 = math.exp %263 : vector<8x128xf32>
    %cst_50 = arith.constant 1.000000e+00 : f32
    %265 = vector.broadcast %cst_50 : f32 to vector<8x128xf32>
    %266 = arith.addf %265, %264 : vector<8x128xf32>
    %267 = arith.divf %265, %266 : vector<8x128xf32>
    %268 = math.tanh %262 : vector<8x128xf32>
    %269 = vector.extract_strided_slice %267 {offsets = [0, 0], sizes = [8, 32], strides = [1, 1]} : vector<8x128xf32> to vector<8x32xf32>
    %270 = vector.extract_strided_slice %267 {offsets = [0, 32], sizes = [8, 32], strides = [1, 1]} : vector<8x128xf32> to vector<8x32xf32>
    %271 = vector.extract_strided_slice %268 {offsets = [0, 64], sizes = [8, 32], strides = [1, 1]} : vector<8x128xf32> to vector<8x32xf32>
    %272 = vector.extract_strided_slice %267 {offsets = [0, 96], sizes = [8, 32], strides = [1, 1]} : vector<8x128xf32> to vector<8x32xf32>
    %273 = arith.mulf %269, %237 : vector<8x32xf32>
    %274 = arith.mulf %270, %271 : vector<8x32xf32>
    %275 = arith.addf %273, %274 : vector<8x32xf32>
    %276 = math.tanh %275 : vector<8x32xf32>
    %277 = arith.mulf %272, %276 : vector<8x32xf32>
    %cst_51 = arith.constant dense<0.000000e+00> : vector<8x128xf32>
    %278 = tpu.matmul %239, %1, %cst_51 {dimension_numbers = #tpu.dot_dimension_numbers<[1], [0], [0], [1], [0, 0, 1, 1], [], []>} : vector<8x32xf32>, vector<32x128xf32>, vector<8x128xf32> -> vector<8x128xf32>
    %279 = vector.broadcast %5 : vector<1x128xf32> to vector<8x128xf32>
    %280 = arith.addf %278, %279 : vector<8x128xf32>
    %cst_52 = arith.constant dense<0.000000e+00> : vector<8x128xf32>
    %281 = tpu.matmul %259, %3, %cst_52 {dimension_numbers = #tpu.dot_dimension_numbers<[1], [0], [0], [1], [0, 0, 1, 1], [], []>} : vector<8x32xf32>, vector<32x128xf32>, vector<8x128xf32> -> vector<8x128xf32>
    %282 = arith.addf %280, %281 : vector<8x128xf32>
    %283 = arith.negf %282 : vector<8x128xf32>
    %284 = math.exp %283 : vector<8x128xf32>
    %cst_53 = arith.constant 1.000000e+00 : f32
    %285 = vector.broadcast %cst_53 : f32 to vector<8x128xf32>
    %286 = arith.addf %285, %284 : vector<8x128xf32>
    %287 = arith.divf %285, %286 : vector<8x128xf32>
    %288 = math.tanh %282 : vector<8x128xf32>
    %289 = vector.extract_strided_slice %287 {offsets = [0, 0], sizes = [8, 32], strides = [1, 1]} : vector<8x128xf32> to vector<8x32xf32>
    %290 = vector.extract_strided_slice %287 {offsets = [0, 32], sizes = [8, 32], strides = [1, 1]} : vector<8x128xf32> to vector<8x32xf32>
    %291 = vector.extract_strided_slice %288 {offsets = [0, 64], sizes = [8, 32], strides = [1, 1]} : vector<8x128xf32> to vector<8x32xf32>
    %292 = vector.extract_strided_slice %287 {offsets = [0, 96], sizes = [8, 32], strides = [1, 1]} : vector<8x128xf32> to vector<8x32xf32>
    %293 = arith.mulf %289, %257 : vector<8x32xf32>
    %294 = arith.mulf %290, %291 : vector<8x32xf32>
    %295 = arith.addf %293, %294 : vector<8x32xf32>
    %296 = math.tanh %295 : vector<8x32xf32>
    %297 = arith.mulf %292, %296 : vector<8x32xf32>
    %cst_54 = arith.constant dense<0.000000e+00> : vector<8x128xf32>
    %298 = tpu.matmul %277, %1, %cst_54 {dimension_numbers = #tpu.dot_dimension_numbers<[1], [0], [0], [1], [0, 0, 1, 1], [], []>} : vector<8x32xf32>, vector<32x128xf32>, vector<8x128xf32> -> vector<8x128xf32>
    %299 = vector.broadcast %5 : vector<1x128xf32> to vector<8x128xf32>
    %300 = arith.addf %298, %299 : vector<8x128xf32>
    %cst_55 = arith.constant dense<0.000000e+00> : vector<8x128xf32>
    %301 = tpu.matmul %297, %3, %cst_55 {dimension_numbers = #tpu.dot_dimension_numbers<[1], [0], [0], [1], [0, 0, 1, 1], [], []>} : vector<8x32xf32>, vector<32x128xf32>, vector<8x128xf32> -> vector<8x128xf32>
    %302 = arith.addf %300, %301 : vector<8x128xf32>
    %303 = arith.negf %302 : vector<8x128xf32>
    %304 = math.exp %303 : vector<8x128xf32>
    %cst_56 = arith.constant 1.000000e+00 : f32
    %305 = vector.broadcast %cst_56 : f32 to vector<8x128xf32>
    %306 = arith.addf %305, %304 : vector<8x128xf32>
    %307 = arith.divf %305, %306 : vector<8x128xf32>
    %308 = math.tanh %302 : vector<8x128xf32>
    %309 = vector.extract_strided_slice %307 {offsets = [0, 0], sizes = [8, 32], strides = [1, 1]} : vector<8x128xf32> to vector<8x32xf32>
    %310 = vector.extract_strided_slice %307 {offsets = [0, 32], sizes = [8, 32], strides = [1, 1]} : vector<8x128xf32> to vector<8x32xf32>
    %311 = vector.extract_strided_slice %308 {offsets = [0, 64], sizes = [8, 32], strides = [1, 1]} : vector<8x128xf32> to vector<8x32xf32>
    %312 = vector.extract_strided_slice %307 {offsets = [0, 96], sizes = [8, 32], strides = [1, 1]} : vector<8x128xf32> to vector<8x32xf32>
    %313 = arith.mulf %309, %295 : vector<8x32xf32>
    %314 = arith.mulf %310, %311 : vector<8x32xf32>
    %315 = arith.addf %313, %314 : vector<8x32xf32>
    %316 = math.tanh %315 : vector<8x32xf32>
    %317 = arith.mulf %312, %316 : vector<8x32xf32>
    %c0_57 = arith.constant 0 : index
    %c0_58 = arith.constant 0 : index
    %318 = vector.load %arg7[%c0_57, %c0_58] : memref<32x128xf32, #tpu.memory_space<vmem>>, vector<32x128xf32>
    %cst_59 = arith.constant dense<0.000000e+00> : vector<8x128xf32>
    %319 = tpu.matmul %317, %318, %cst_59 {dimension_numbers = #tpu.dot_dimension_numbers<[1], [0], [0], [1], [0, 0, 1, 1], [], []>} : vector<8x32xf32>, vector<32x128xf32>, vector<8x128xf32> -> vector<8x128xf32>
    %c0_60 = arith.constant 0 : index
    %c0_61 = arith.constant 0 : index
    %320 = vector.load %arg8[%c0_60, %c0_61] : memref<1x128xf32, #tpu.memory_space<vmem>>, vector<1x128xf32>
    %321 = vector.broadcast %320 : vector<1x128xf32> to vector<8x128xf32>
    %322 = arith.addf %319, %321 : vector<8x128xf32>
    %c0_62 = arith.constant 0 : index
    %c0_63 = arith.constant 0 : index
    %323 = vector.load %arg9[%c0_62, %c0_63] : memref<8x128xf32, #tpu.memory_space<vmem>>, vector<8x128xf32>
    tpu.vector_store %arg9[%c0_62, %c0_63], %322 {strides = array<i32>} : memref<8x128xf32, #tpu.memory_space<vmem>>, vector<8x128xf32>,
    return
  }
}

</mosaic_0001>

<bundles_post_ra>
// kernel: net_forward.1
= control target key start
LH: loop header
LB: loop body
LE: loop exit
PB: predicated region body
PF: predicated region fallthrough
CT: control target
= control target key end

     0   :  { %14 = vsyncpa [#allocation3], 0  ;;  %s3269_s30 = smov [#allocation2]   ;;  %s3764_s0 = inlined_call_operand.vmem [shape: f32[64,8], index: 0, kind: input, shape index: {}]   ;;  %s3765_s1 = inlined_call_operand.vmem [shape: f32[8,128], index: 1, kind: input, shape index: {}]   ;;  %s3766_s2 = inlined_call_operand.vmem [shape: f32[32,128], index: 2, kind: input, shape index: {}]   ;;  %s3767_s3 = inlined_call_operand.vmem [shape: f32[1,128], index: 3, kind: input, shape index: {}]   ;;  %s3768_s4 = inlined_call_operand.vmem [shape: f32[32,128], index: 4, kind: input, shape index: {}]   ;;  %s3769_s5 = inlined_call_operand.vmem [shape: f32[32,128], index: 5, kind: input, shape index: {}]   ;;  %s3770_s6 = inlined_call_operand.vmem [shape: f32[1,128], index: 6, kind: input, shape index: {}]   ;;  %s3771_s7 = inlined_call_operand.hbm [shape: f32[32,128], index: 7, kind: input, shape index: {}]   ;;  %s3772_s8 = inlined_call_operand.vmem [shape: f32[1,128], index: 8, kind: input, shape index: {}]   ;;  %s3773_s9 = inlined_call_operand.vmem [shape: f32[8,128], index: 9, kind: output, shape index: {}]  }
   0x1   :  { %s34_s10 = sshll.u32 %s3269_s30, 4  ;;  %s3245_s13 = scalar_lea.hbm %s3771_s7, 512  ;;  %s35_s10 = int_to_ptr.vmem [resolvable:$true] %s34_s10 }
   0x2   :  { %p3246_p0 = scmp.ne.s32.totalorder %s3771_s7, %s3245_s13  ;;  %p3249_p1 = scmp.lt.u32.totalorder %s3245_s13, %s3771_s7 }
   0x4   :  { %p3251_p2 = pnand %p3249_p1, %p3246_p0 }
   0x6   :  { %3254 = shalt.err (!%p3251_p2)
}
   0x7   :  { %s3255_s18 = scalar_lea.vmem %s35_s10, 512  ;;  %p3260_p4 = scmp.lt.s32.totalorder %s35_s10, %s35_s10 }
   0x8   :  { %p3256_p3 = scmp.ne.s32.totalorder %s35_s10, %s3255_s18  ;;  %p3261_p5 = scmp.lt.s32.totalorder %s3255_s18, %s3255_s18 }
   0xa   :  { %p3262_p6 = por %p3261_p5, %p3260_p4 }
   0xc   :  { %p3263_p7 = pnand %p3262_p6, %p3256_p3 }
   0xe   :  { %3266 = shalt.err (!%p3263_p7)
}
   0xf   :  { %s3270_s19 = smov 128   ;;  %s3271_s20 = smov 8  }
  0x10   :  { %40 = dma.hbm_to_vmem [thread:$0]  %s3771_s7, 512, %s35_s10, [#allocation3], %s3270_s19, %s3270_s19, %s3271_s20  }
  0x11   :  { %3267 = dma.done.wait [#allocation3], 512  }
  0x12   :  { %3268 = vsyncadd [#allocation3], 4294966784  ;;  %v3272_v0 = vmov 0.0|0.0   ;;  %vm3273_vm0 = vmmov 0   ;;  %v3274_v1 = vmov 0.0   ;;  %vm75_vm1 = vcmask 64512  }
  0x13   :  { %2935 = vmatprep.subr.bf16.mxu1 %v3272_v0  ;;  %2668 = vmatprep.mubr.msk.f32.mxu1 %vm3273_vm0, %v3274_v1  ;;  %v51_v2 = vld [vmem:[%s3766_s2] sm:$0xff]  ;;  %v52_v3 = vld [vmem:[%s3766_s2 + $0x8] sm:$0xff]  ;;  %v53_v8 = vld [vmem:[%s3766_s2 + $0x10] sm:$0xff]  ;;  %s3275_s15 = smov 96   ;;  %vm205_vm2 = vcmask 261120  }
  0x14   :  { %v46_v4 = vld [vmem:[%s3765_s1] sm:$0xff]  ;;  %v3351_v5 = vpack.c.bf16 %v52_v3, %v51_v2  ;;  %v62_v7 = vld [vmem:[%s3764_s0 + $0x8] sm:$0xff]  ;;  %v54_v9 = vld [vmem:[%s3766_s2 + $0x18] sm:$0xff] }
  0x15   :  { %2646 = vmatprep.subr.mxu0 %v46_v4  ;;  %v61_v6 = vld [vmem:[%s3764_s0] sm:$0xff]  ;;  %v3368_v10 = vpack.c.bf16 %v54_v9, %v53_v8  ;;  %v63_v28 = vld [vmem:[%s3764_s0 + $0x10] sm:$0xff]  ;;  %v64_v29 = vld [vmem:[%s3764_s0 + $0x18] sm:$0xff] }
  0x16   :  { %2647 = vmatpush3.msra.mxu0 %v46_v4  ;;  %2648 = vmatprep.mubr.msk.f32.mxu0 %vm75_vm1, %v61_v6  ;;  %v3386_v12 = vld [vmem:[%s3767_s3] ss:$0 sm:$0xff]  ;;  %v48_v32 = vld [vmem:[%s3768_s4 + $0x8] sm:$0xff]  ;;  %v49_v34 = vld [vmem:[%s3768_s4 + $0x10] sm:$0xff] }
  0x17   :  { %2937 = vmatpush3.bf16.msra.mxu1 %v3351_v5  ;;  %2649 = vmatmul.mubr.msk.f32.vlgmr.msra.gmra.mrb[0].mxu0 %vm75_vm1, %v62_v7  ;;  %v65_v30 = vld [vmem:[%s3764_s0 + $0x20] sm:$0xff]  ;;  %v66_v35 = vld [vmem:[%s3764_s0 + $0x28] sm:$0xff]  ;;  %v50_v36 = vld [vmem:[%s3768_s4 + $0x18] sm:$0xff] }
  0x18   :  { %2938 = vmatprep.subr.bf16.mxu1 %v3272_v0  ;;  %2947 = vmatprep.subr.bf16.mxu0 %v3272_v0  ;;  %v47_v31 = vld [vmem:[%s3768_s4] sm:$0xff]  ;;  %v67_v37 = vld [vmem:[%s3764_s0 + $0x30] sm:$0xff]  ;;  %v3427_v38 = vpack.c.bf16 %v50_v36, %v49_v34  ;;  %v68_v39 = vld [vmem:[%s3764_s0 + $0x38] sm:$0xff]  ;;  %s3276_s4 = smov 32  }
  0x19   :  { %2651 = vmatprep.mubr.msk.f32.mxu0 %vm75_vm1, %v63_v28  ;;  %v3411_v33 = vpack.c.bf16 %v48_v32, %v47_v31  ;;  %v55_v47 = vld [vmem:[%s3769_s5] sm:$0xff]  ;;  %v56_v48 = vld [vmem:[%s3769_s5 + $0x8] sm:$0xff]  ;;  %v57_v50 = vld [vmem:[%s3769_s5 + $0x10] sm:$0xff] }
  0x1a   :  { %v3456_v49 = vpack.c.bf16 %v56_v48, %v55_v47  ;;  %v58_v51 = vld [vmem:[%s3769_s5 + $0x18] sm:$0xff]  ;;  %v3496_v60 = vld [vmem:[%s3770_s6] ss:$0 sm:$0xff] }
  0x1b   :  { %2940 = vmatpush3.bf16.msra.mxu1 %v3368_v10  ;;  %2652 = vmatmul.mubr.msk.f32.gmra.mrb[2].mxu0 %vm75_vm1, %v64_v29  ;;  %v3467_v53 = vpack.c.bf16 %v58_v51, %v57_v50 }
  0x1c   :  { %2941 = vmatprep.subr.bf16.mxu1 %v3272_v0  ;;  %2654 = vmatprep.mubr.msk.f32.mxu0 %vm75_vm1, %v65_v30 }
  0x1d   :  { %2949 = vmatpush3.bf16.msra.mxu0 %v3411_v33 }
  0x1e   :  { %2669 = vmatmul.mubr.f32.vlgmr.msra.gmra.mrb[0].mxu1 %v3274_v1  ;;  %2950 = vmatprep.subr.bf16.mxu0 %v3272_v0 }
  0x1f   :  { %2943 = vmatpush3.bf16.msra.mxu1 %v3351_v5  ;;  %2679 = vmatprep.mubr.msk.f32.mxu1 %vm3273_vm0, %v3274_v1 }
  0x20   :  { %2944 = vmatprep.subr.bf16.mxu1 %v3272_v0  ;;  %2655 = vmatmul.mubr.msk.f32.gmra.mrb[4].mxu0 %vm75_vm1, %v66_v35 }
  0x21   :  { %2657 = vmatprep.mubr.msk.f32.mxu0 %vm75_vm1, %v67_v37  ;;  %2952 = vmatpush3.bf16.msra.mxu0 %v3427_v38 }
  0x22   :  { %2953 = vmatprep.subr.bf16.mxu0 %v3272_v0 }
  0x23   :  { %2946 = vmatpush3.bf16.msra.mxu1 %v3368_v10 }
  0x24   :  { %2959 = vmatprep.subr.bf16.mxu1 %v3272_v0  ;;  %2658 = vmatmul.mubr.msk.f32.gmra.mrb[6].mxu0 %vm75_vm1, %v68_v39 }
  0x25   :  { %2690 = vmatprep.mubr.msk.f32.mxu0 %vm3273_vm0, %v3274_v1 }
  0xea   :  { %v3381_v11 = vpop.f32.mrb[0].mxu0 }
  0xeb   :  { %v166_v13 = vpop.f32.mrb[1].mxu0  ;;  %v172_v56 = vadd.f32 %v3381_v11, %v3386_v12 }
  0xec   :  { %v167_v14 = vadd.f32 %v3386_v12, %v166_v13 }
  0xee   :  { %v3442_v43 = vpop.f32.mrb[2].mxu0 }
  0xef   :  { %v3444_v44 = vpop.f32.mrb[3].mxu0 }
  0xf0   :  { %v177_v34 = vadd.f32 %v3386_v12, %v3444_v44 }
  0xf1   :  { %v275_v15 = vpop.f32.mrb[0].mxu1 }
  0xf2   :  { %v279_v16 = vadd.f32 %v275_v15, %v167_v14  ;;  %v2670_v17 = vpop.f32.mrb[1].mxu1 }
  0xf3   :  { %v3446_v45 = vpop.f32.mrb[4].mxu0 }
  0xf4   :  { %3117 = vtanh.f32 %v279_v16  ;;  %v2471_v19 = vmul.f32 -1.442695, %v279_v16  ;;  %v3448_v46 = vpop.f32.mrb[5].mxu0 }
  0xf6   :  { %3119 = vpow2.f32 %v2471_v19 }
  0xf7   :  { %v3487_v54 = vpop.f32.mrb[6].mxu0 }
  0xf8   :  { %v3489_v55 = vpop.f32.mrb[7].mxu0 }
  0xfe   :  { %v3118_v18 = vpop.eup %3117 }
  0xff   :  { %289 = vrot.lane.b32.xlu0 %v3118_v18, %s3275_s15 }
 0x100   :  { %v3120_v20 = vpop.eup %3119 }
 0x101   :  { %v283_v21 = vadd.f32 1.0, %v3120_v20 }
 0x103   :  { %3121 = vrcp.f32 %v283_v21 }
 0x10d   :  { %v3122_v22 = vpop.eup %3121 }
 0x10e   :  { %v287_v25 = vmul.f32 0.0, %v3122_v22 }
 0x171   :  { %v290_v23 = vpop.permute.xlu0 %289 }
 0x172   :  { %v292_v24 = vmul.f32 %v3122_v22, %v290_v23 }
 0x174   :  { %294 = vrot.lane.b32.xlu0 %v292_v24, %s3275_s15 }
 0x1e6   :  { %v295_v26 = vpop.permute.xlu0 %294 }
 0x1e7   :  { %v3391_v27 = vadd.f32 %v295_v26, %v287_v25 }
 0x1e9   :  { %3123 = vtanh.f32 %v3391_v27 }
 0x1f3   :  { %v3124_v40 = vpop.eup %3123 }
 0x1f4   :  { %300 = vrot.lane.b32.xlu1 %v3124_v40, %s3275_s15 }
 0x266   :  { %v301_v41 = vpop.permute.xlu1 %300 }
 0x267   :  { %v303_v42 = vmul.f32 %v3122_v22, %v301_v41 }
 0x269   :  { %305 = vrot.lane.b32.xlu1 %v303_v42, %s3276_s4 }
 0x2db   :  { %v306_v52 = vpop.permute.xlu1 %305 }
 0x2dc   :  { %2680 = vmatmul.mubr.msk.f32.vlgmr.msra.gmra.mrb[2].mxu1 %vm205_vm2, %v306_v52  ;;  %2691 = vmatmul.mubr.msk.f32.vlgmr.msra.gmra.mrb[8].mxu0 %vm205_vm2, %v306_v52 }
 0x2dd   :  { %2955 = vmatpush3.bf16.msra.mxu0 %v3456_v49  ;;  %2701 = vmatprep.mubr.msk.f32.mxu0 %vm3273_vm0, %v3274_v1 }
 0x2de   :  { %2956 = vmatprep.subr.bf16.mxu0 %v3272_v0  ;;  %2961 = vmatpush3.bf16.msra.mxu1 %v3351_v5 }
 0x2df   :  { %2962 = vmatprep.subr.bf16.mxu1 %v3272_v0  ;;  %2712 = vmatprep.mubr.msk.f32.mxu1 %vm3273_vm0, %v3274_v1 }
 0x2e1   :  { %2958 = vmatpush3.bf16.msra.mxu0 %v3467_v53 }
 0x2e2   :  { %2964 = vmatpush3.bf16.msra.mxu1 %v3368_v10  ;;  %2977 = vmatprep.subr.bf16.mxu0 %v3272_v0 }
 0x2e3   :  { %2965 = vmatprep.subr.bf16.mxu1 %v3272_v0 }
 0x2e4   :  { %2702 = vmatmul.mubr.f32.vlgmr.msra.gmra.mrb[8].mxu0 %v3274_v1 }
 0x2e5   :  { %2979 = vmatpush3.bf16.msra.mxu0 %v3351_v5  ;;  %2745 = vmatprep.mubr.msk.f32.mxu0 %vm3273_vm0, %v3274_v1 }
 0x2e6   :  { %2980 = vmatprep.subr.bf16.mxu0 %v3272_v0 }
 0x2e9   :  { %2982 = vmatpush3.bf16.msra.mxu0 %v3368_v10 }
 0x2ea   :  { %2983 = vmatprep.subr.bf16.mxu0 %v3272_v0 }
 0x3af   :  { %v375_v57 = vpop.f32.mrb[2].mxu1 }
 0x3b0   :  { %v379_v58 = vadd.f32 %v375_v57, %v172_v56  ;;  %v2681_v59 = vpop.f32.mrb[3].mxu1 }
 0x3b2   :  { %3125 = vtanh.f32 %v379_v58  ;;  %v2473_v4 = vmul.f32 -1.442695, %v379_v58 }
 0x3b7   :  { %v546_v61 = vpop.f32.mrb[8].mxu0 }
 0x3b8   :  { %v3085_v62 = vadd.f32 %v3496_v60, %v546_v61  ;;  %v2703_v63 = vpop.f32.mrb[9].mxu0 }
 0x3ba   :  { %3127 = vtanh.f32 %v3085_v62  ;;  %v2476_v6 = vmul.f32 -1.442695, %v3085_v62 }
 0x3bb   :  { %3129 = vpow2.f32 %v2473_v4 }
 0x3bc   :  { %v3126_v2 = vpop.eup %3125  ;;  %3131 = vpow2.f32 %v2476_v6 }
 0x3bd   :  { %389 = vrot.lane.b32.xlu0 %v3126_v2, %s3275_s15 }
 0x3c4   :  { %v3128_v3 = vpop.eup %3127 }
 0x3c5   :  { %560 = vrot.lane.b32.xlu1 %v3128_v3, %s3275_s15  ;;  %v3130_v7 = vpop.eup %3129 }
 0x3c6   :  { %v383_v8 = vadd.f32 1.0, %v3130_v7  ;;  %v3132_v9 = vpop.eup %3131 }
 0x3c7   :  { %v554_v11 = vadd.f32 1.0, %v3132_v9 }
 0x3c8   :  { %3133 = vrcp.f32 %v383_v8 }
 0x3c9   :  { %3135 = vrcp.f32 %v554_v11 }
 0x3d2   :  { %v3134_v13 = vpop.eup %3133 }
 0x3d3   :  { %v3136_v16 = vpop.eup %3135  ;;  %v387_v19 = vmul.f32 %v3134_v13, %v3391_v27 }
 0x3d4   :  { %v558_v22 = vmul.f32 0.0, %v3136_v16 }
 0x42f   :  { %v390_v14 = vpop.permute.xlu0 %389 }
 0x430   :  { %v392_v15 = vmul.f32 %v3134_v13, %v390_v14 }
 0x432   :  { %394 = vrot.lane.b32.xlu0 %v392_v15, %s3275_s15 }
 0x437   :  { %v561_v17 = vpop.permute.xlu1 %560 }
 0x438   :  { %v563_v18 = vmul.f32 %v3136_v16, %v561_v17 }
 0x43a   :  { %565 = vrot.lane.b32.xlu1 %v563_v18, %s3275_s15 }
 0x4a4   :  { %v395_v20 = vpop.permute.xlu0 %394 }
 0x4a5   :  { %v3504_v21 = vadd.f32 %v395_v20, %v387_v19  ;;  %v182_v19 = vadd.f32 %v3442_v43, %v3386_v12 }
 0x4a7   :  { %3137 = vtanh.f32 %v3504_v21 }
 0x4ac   :  { %v566_v23 = vpop.permute.xlu1 %565 }
 0x4ad   :  { %v3507_v24 = vadd.f32 %v566_v23, %v558_v22 }
 0x4af   :  { %3139 = vtanh.f32 %v3507_v24 }
 0x4b1   :  { %v3138_v25 = vpop.eup %3137 }
 0x4b2   :  { %400 = vrot.lane.b32.xlu0 %v3138_v25, %s3275_s15 }
 0x4b9   :  { %v3140_v26 = vpop.eup %3139 }
 0x4ba   :  { %571 = vrot.lane.b32.xlu1 %v3140_v26, %s3275_s15 }
 0x524   :  { %v401_v28 = vpop.permute.xlu0 %400 }
 0x525   :  { %v403_v29 = vmul.f32 %v3134_v13, %v401_v28 }
 0x527   :  { %576 = vrot.lane.b32.xlu0 %v403_v29, %s3276_s4 }
 0x52c   :  { %v572_v27 = vpop.permute.xlu1 %571 }
 0x52d   :  { %v574_v30 = vmul.f32 %v3136_v16, %v572_v27 }
 0x52f   :  { %746 = vrot.lane.b32.xlu1 %v574_v30, %s3276_s4 }
 0x599   :  { %v577_v31 = vpop.permute.xlu0 %576 }
 0x59a   :  { %2713 = vmatmul.mubr.msk.f32.vlgmr.msra.gmra.mrb[4].mxu1 %vm205_vm2, %v577_v31 }
 0x59b   :  { %2967 = vmatpush3.bf16.msra.mxu1 %v3411_v33  ;;  %2723 = vmatprep.mubr.msk.f32.mxu1 %vm3273_vm0, %v3274_v1 }
 0x59c   :  { %2968 = vmatprep.subr.bf16.mxu1 %v3272_v0 }
 0x59f   :  { %2970 = vmatpush3.bf16.msra.mxu1 %v3427_v38 }
 0x5a0   :  { %2971 = vmatprep.subr.bf16.mxu1 %v3272_v0 }
 0x5a1   :  { %v747_v32 = vpop.permute.xlu1 %746 }
 0x5a2   :  { %2724 = vmatmul.mubr.msk.f32.vlgmr.msra.gmra.mrb[6].mxu1 %vm205_vm2, %v577_v31 }
 0x5a3   :  { %2973 = vmatpush3.bf16.msra.mxu1 %v3456_v49  ;;  %2734 = vmatprep.mubr.msk.f32.mxu1 %vm3273_vm0, %v3274_v1 }
 0x5a4   :  { %2974 = vmatprep.subr.bf16.mxu1 %v3272_v0 }
 0x5a7   :  { %2976 = vmatpush3.bf16.msra.mxu1 %v3467_v53 }
 0x5a8   :  { %2995 = vmatprep.subr.bf16.mxu1 %v3272_v0 }
 0x5aa   :  { %2735 = vmatmul.mubr.msk.f32.vlgmr.msra.gmra.mrb[6].mxu1 %vm205_vm2, %v747_v32 }
 0x5ab   :  { %2997 = vmatpush3.bf16.msra.mxu1 %v3351_v5  ;;  %2778 = vmatprep.mubr.msk.f32.mxu1 %vm3273_vm0, %v3274_v1 }
 0x5ac   :  { %2998 = vmatprep.subr.bf16.mxu1 %v3272_v0 }
 0x5af   :  { %3000 = vmatpush3.bf16.msra.mxu1 %v3368_v10 }
 0x5b0   :  { %3001 = vmatprep.subr.bf16.mxu1 %v3272_v0 }
 0x66d   :  { %v646_v35 = vpop.f32.mrb[4].mxu1 }
 0x66e   :  { %v650_v36 = vadd.f32 %v646_v35, %v177_v34  ;;  %v2714_v37 = vpop.f32.mrb[5].mxu1 }
 0x670   :  { %3141 = vtanh.f32 %v650_v36  ;;  %v2478_v48 = vmul.f32 -1.442695, %v650_v36 }
 0x67a   :  { %v3142_v39 = vpop.eup %3141 }
 0x67b   :  { %660 = vrot.lane.b32.xlu0 %v3142_v39, %s3275_s15 }
 0x67d   :  { %v816_v40 = vpop.f32.mrb[6].mxu1 }
 0x67e   :  { %v3086_v41 = vadd.f32 %v3496_v60, %v816_v40  ;;  %v2736_v42 = vpop.f32.mrb[7].mxu1 }
 0x680   :  { %3143 = vtanh.f32 %v3086_v41  ;;  %v2481_v51 = vmul.f32 -1.442695, %v3086_v41 }
 0x681   :  { %3145 = vpow2.f32 %v2478_v48 }
 0x682   :  { %3147 = vpow2.f32 %v2481_v51 }
 0x68a   :  { %v3144_v47 = vpop.eup %3143 }
 0x68b   :  { %830 = vrot.lane.b32.xlu1 %v3144_v47, %s3275_s15  ;;  %v3146_v50 = vpop.eup %3145 }
 0x68c   :  { %v654_v44 = vadd.f32 1.0, %v3146_v50  ;;  %v3148_v52 = vpop.eup %3147 }
 0x68d   :  { %v824_v59 = vadd.f32 1.0, %v3148_v52 }
 0x68e   :  { %3149 = vrcp.f32 %v654_v44 }
 0x68f   :  { %3151 = vrcp.f32 %v824_v59 }
 0x698   :  { %v3150_v56 = vpop.eup %3149 }
 0x699   :  { %v3152_v61 = vpop.eup %3151  ;;  %v658_v2 = vmul.f32 %v3150_v56, %v3504_v21 }
 0x69a   :  { %v828_v7 = vmul.f32 %v3152_v61, %v3507_v24 }
 0x6ed   :  { %v661_v57 = vpop.permute.xlu0 %660 }
 0x6ee   :  { %v663_v58 = vmul.f32 %v3150_v56, %v661_v57 }
 0x6f0   :  { %665 = vrot.lane.b32.xlu0 %v663_v58, %s3275_s15 }
 0x6fd   :  { %v831_v62 = vpop.permute.xlu1 %830 }
 0x6fe   :  { %v833_v63 = vmul.f32 %v3152_v61, %v831_v62 }
 0x700   :  { %835 = vrot.lane.b32.xlu1 %v833_v63, %s3275_s15  ;;  %v187_v63 = vadd.f32 %v3386_v12, %v3448_v46 }
 0x762   :  { %v666_v3 = vpop.permute.xlu0 %665 }
 0x763   :  { %v3543_v4 = vadd.f32 %v666_v3, %v658_v2 }
 0x765   :  { %3153 = vtanh.f32 %v3543_v4 }
 0x76f   :  { %v3154_v6 = vpop.eup %3153 }
 0x770   :  { %671 = vrot.lane.b32.xlu0 %v3154_v6, %s3275_s15 }
 0x772   :  { %v836_v8 = vpop.permute.xlu1 %835 }
 0x773   :  { %v3548_v9 = vadd.f32 %v836_v8, %v828_v7 }
 0x775   :  { %3155 = vtanh.f32 %v3548_v9 }
 0x77f   :  { %v3156_v11 = vpop.eup %3155 }
 0x780   :  { %841 = vrot.lane.b32.xlu1 %v3156_v11, %s3275_s15 }
 0x7e2   :  { %v672_v13 = vpop.permute.xlu0 %671 }
 0x7e3   :  { %v674_v14 = vmul.f32 %v3150_v56, %v672_v13 }
 0x7e5   :  { %846 = vrot.lane.b32.xlu0 %v674_v14, %s3276_s4 }
 0x7f2   :  { %v842_v15 = vpop.permute.xlu1 %841 }
 0x7f3   :  { %v844_v16 = vmul.f32 %v3152_v61, %v842_v15 }
 0x7f5   :  { %1016 = vrot.lane.b32.xlu1 %v844_v16, %s3276_s4 }
 0x857   :  { %v847_v17 = vpop.permute.xlu0 %846 }
 0x858   :  { %2746 = vmatmul.mubr.msk.f32.vlgmr.msra.gmra.mrb[10].mxu0 %vm205_vm2, %v847_v17 }
 0x859   :  { %2985 = vmatpush3.bf16.msra.mxu0 %v3411_v33  ;;  %2756 = vmatprep.mubr.msk.f32.mxu0 %vm3273_vm0, %v3274_v1 }
 0x85a   :  { %2986 = vmatprep.subr.bf16.mxu0 %v3272_v0 }
 0x85d   :  { %2988 = vmatpush3.bf16.msra.mxu0 %v3427_v38 }
 0x85e   :  { %2989 = vmatprep.subr.bf16.mxu0 %v3272_v0 }
 0x860   :  { %2757 = vmatmul.mubr.msk.f32.vlgmr.msra.gmra.mrb[12].mxu0 %vm205_vm2, %v847_v17 }
 0x861   :  { %2991 = vmatpush3.bf16.msra.mxu0 %v3456_v49  ;;  %2767 = vmatprep.mubr.msk.f32.mxu0 %vm3273_vm0, %v3274_v1 }
 0x862   :  { %2992 = vmatprep.subr.bf16.mxu0 %v3272_v0 }
 0x865   :  { %2994 = vmatpush3.bf16.msra.mxu0 %v3467_v53 }
 0x866   :  { %3013 = vmatprep.subr.bf16.mxu0 %v3272_v0 }
 0x867   :  { %v1017_v18 = vpop.permute.xlu1 %1016 }
 0x868   :  { %2768 = vmatmul.mubr.msk.f32.vlgmr.msra.gmra.mrb[12].mxu0 %vm205_vm2, %v1017_v18 }
 0x869   :  { %3015 = vmatpush3.bf16.msra.mxu0 %v3351_v5  ;;  %2811 = vmatprep.mubr.msk.f32.mxu0 %vm3273_vm0, %v3274_v1 }
 0x86a   :  { %3016 = vmatprep.subr.bf16.mxu0 %v3272_v0 }
 0x86d   :  { %3018 = vmatpush3.bf16.msra.mxu0 %v3368_v10 }
 0x86e   :  { %3019 = vmatprep.subr.bf16.mxu0 %v3272_v0 }
 0x92b   :  { %v916_v20 = vpop.f32.mrb[10].mxu0 }
 0x92c   :  { %v920_v21 = vadd.f32 %v916_v20, %v182_v19  ;;  %v2747_v22 = vpop.f32.mrb[11].mxu0 }
 0x92e   :  { %3157 = vtanh.f32 %v920_v21  ;;  %v2483_v29 = vmul.f32 -1.442695, %v920_v21 }
 0x938   :  { %v3158_v23 = vpop.eup %3157 }
 0x939   :  { %930 = vrot.lane.b32.xlu0 %v3158_v23, %s3275_s15 }
 0x93b   :  { %v1086_v24 = vpop.f32.mrb[12].mxu0 }
 0x93c   :  { %v3087_v25 = vadd.f32 %v3496_v60, %v1086_v24  ;;  %v2769_v26 = vpop.f32.mrb[13].mxu0 }
 0x93e   :  { %3159 = vtanh.f32 %v3087_v25  ;;  %v2486_v30 = vmul.f32 -1.442695, %v3087_v25 }
 0x93f   :  { %3161 = vpow2.f32 %v2483_v29 }
 0x940   :  { %3163 = vpow2.f32 %v2486_v30 }
 0x948   :  { %v3160_v28 = vpop.eup %3159 }
 0x949   :  { %1100 = vrot.lane.b32.xlu1 %v3160_v28, %s3275_s15  ;;  %v3162_v27 = vpop.eup %3161 }
 0x94a   :  { %v924_v43 = vadd.f32 1.0, %v3162_v27  ;;  %v3164_v31 = vpop.eup %3163 }
 0x94b   :  { %v1094_v36 = vadd.f32 1.0, %v3164_v31 }
 0x94c   :  { %3165 = vrcp.f32 %v924_v43 }
 0x94d   :  { %3167 = vrcp.f32 %v1094_v36 }
 0x956   :  { %v3166_v32 = vpop.eup %3165 }
 0x957   :  { %v3168_v37 = vpop.eup %3167  ;;  %v928_v41 = vmul.f32 %v3166_v32, %v3543_v4 }
 0x958   :  { %v1098_v50 = vmul.f32 %v3168_v37, %v3548_v9 }
 0x9ab   :  { %v931_v34 = vpop.permute.xlu0 %930 }
 0x9ac   :  { %v933_v35 = vmul.f32 %v3166_v32, %v931_v34 }
 0x9ae   :  { %935 = vrot.lane.b32.xlu0 %v933_v35, %s3275_s15 }
 0x9bb   :  { %v1101_v39 = vpop.permute.xlu1 %1100 }
 0x9bc   :  { %v1103_v40 = vmul.f32 %v3168_v37, %v1101_v39  ;;  %v192_v39 = vadd.f32 %v3446_v45, %v3386_v12 }
 0x9be   :  { %1105 = vrot.lane.b32.xlu1 %v1103_v40, %s3275_s15 }
 0xa20   :  { %v936_v42 = vpop.permute.xlu0 %935 }
 0xa21   :  { %v3583_v47 = vadd.f32 %v936_v42, %v928_v41 }
 0xa23   :  { %3169 = vtanh.f32 %v3583_v47 }
 0xa2d   :  { %v3170_v48 = vpop.eup %3169 }
 0xa2e   :  { %941 = vrot.lane.b32.xlu0 %v3170_v48, %s3275_s15 }
 0xa30   :  { %v1106_v51 = vpop.permute.xlu1 %1105 }
 0xa31   :  { %v3588_v44 = vadd.f32 %v1106_v51, %v1098_v50 }
 0xa33   :  { %3171 = vtanh.f32 %v3588_v44 }
 0xa3d   :  { %v3172_v52 = vpop.eup %3171 }
 0xa3e   :  { %1111 = vrot.lane.b32.xlu1 %v3172_v52, %s3275_s15 }
 0xaa0   :  { %v942_v56 = vpop.permute.xlu0 %941 }
 0xaa1   :  { %v944_v57 = vmul.f32 %v3166_v32, %v942_v56 }
 0xaa3   :  { %1116 = vrot.lane.b32.xlu0 %v944_v57, %s3276_s4 }
 0xab0   :  { %v1112_v58 = vpop.permute.xlu1 %1111 }
 0xab1   :  { %v1114_v59 = vmul.f32 %v3168_v37, %v1112_v58 }
 0xab3   :  { %1286 = vrot.lane.b32.xlu1 %v1114_v59, %s3276_s4 }
 0xb15   :  { %v1117_v61 = vpop.permute.xlu0 %1116 }
 0xb16   :  { %2779 = vmatmul.mubr.msk.f32.vlgmr.msra.gmra.mrb[8].mxu1 %vm205_vm2, %v1117_v61 }
 0xb17   :  { %3003 = vmatpush3.bf16.msra.mxu1 %v3411_v33  ;;  %2789 = vmatprep.mubr.msk.f32.mxu1 %vm3273_vm0, %v3274_v1 }
 0xb18   :  { %3004 = vmatprep.subr.bf16.mxu1 %v3272_v0 }
 0xb1b   :  { %3006 = vmatpush3.bf16.msra.mxu1 %v3427_v38 }
 0xb1c   :  { %3007 = vmatprep.subr.bf16.mxu1 %v3272_v0 }
 0xb1e   :  { %2790 = vmatmul.mubr.msk.f32.vlgmr.msra.gmra.mrb[10].mxu1 %vm205_vm2, %v1117_v61 }
 0xb1f   :  { %3009 = vmatpush3.bf16.msra.mxu1 %v3456_v49  ;;  %2800 = vmatprep.mubr.msk.f32.mxu1 %vm3273_vm0, %v3274_v1 }
 0xb20   :  { %3010 = vmatprep.subr.bf16.mxu1 %v3272_v0 }
 0xb23   :  { %3012 = vmatpush3.bf16.msra.mxu1 %v3467_v53 }
 0xb24   :  { %3031 = vmatprep.subr.bf16.mxu1 %v3272_v0 }
 0xb25   :  { %v1287_v62 = vpop.permute.xlu1 %1286 }
 0xb26   :  { %2801 = vmatmul.mubr.msk.f32.vlgmr.msra.gmra.mrb[10].mxu1 %vm205_vm2, %v1287_v62 }
 0xb27   :  { %3033 = vmatpush3.bf16.msra.mxu1 %v3351_v5  ;;  %2844 = vmatprep.mubr.msk.f32.mxu1 %vm3273_vm0, %v3274_v1 }
 0xb28   :  { %3034 = vmatprep.subr.bf16.mxu1 %v3272_v0 }
 0xb2b   :  { %3036 = vmatpush3.bf16.msra.mxu1 %v3368_v10 }
 0xb2c   :  { %3037 = vmatprep.subr.bf16.mxu1 %v3272_v0 }
 0xbe9   :  { %v1186_v2 = vpop.f32.mrb[8].mxu1 }
 0xbea   :  { %v1190_v3 = vadd.f32 %v1186_v2, %v187_v63  ;;  %v2780_v4 = vpop.f32.mrb[9].mxu1 }
 0xbec   :  { %3173 = vtanh.f32 %v1190_v3  ;;  %v2488_v13 = vmul.f32 -1.442695, %v1190_v3 }
 0xbf6   :  { %v3174_v6 = vpop.eup %3173 }
 0xbf7   :  { %1200 = vrot.lane.b32.xlu0 %v3174_v6, %s3275_s15 }
 0xbf9   :  { %v1356_v7 = vpop.f32.mrb[10].mxu1 }
 0xbfa   :  { %v3088_v8 = vadd.f32 %v3496_v60, %v1356_v7  ;;  %v2802_v9 = vpop.f32.mrb[11].mxu1 }
 0xbfc   :  { %3175 = vtanh.f32 %v3088_v8  ;;  %v2491_v15 = vmul.f32 -1.442695, %v3088_v8 }
 0xbfd   :  { %3177 = vpow2.f32 %v2488_v13 }
 0xbfe   :  { %3179 = vpow2.f32 %v2491_v15 }
 0xc06   :  { %v3176_v11 = vpop.eup %3175 }
 0xc07   :  { %1370 = vrot.lane.b32.xlu1 %v3176_v11, %s3275_s15  ;;  %v3178_v14 = vpop.eup %3177 }
 0xc08   :  { %v1194_v46 = vadd.f32 1.0, %v3178_v14  ;;  %v3180_v16 = vpop.eup %3179 }
 0xc09   :  { %v1364_v20 = vadd.f32 1.0, %v3180_v16 }
 0xc0a   :  { %3181 = vrcp.f32 %v1194_v46 }
 0xc0b   :  { %3183 = vrcp.f32 %v1364_v20 }
 0xc14   :  { %v3182_v17 = vpop.eup %3181 }
 0xc15   :  { %v3184_v21 = vpop.eup %3183  ;;  %v1198_v24 = vmul.f32 %v3182_v17, %v3583_v47 }
 0xc16   :  { %v1368_v29 = vmul.f32 %v3184_v21, %v3588_v44 }
 0xc69   :  { %v1201_v18 = vpop.permute.xlu0 %1200 }
 0xc6a   :  { %v1203_v19 = vmul.f32 %v3182_v17, %v1201_v18 }
 0xc6c   :  { %1205 = vrot.lane.b32.xlu0 %v1203_v19, %s3275_s15  ;;  %v197_v19 = vadd.f32 %v3386_v12, %v3489_v55 }
 0xc79   :  { %v1371_v22 = vpop.permute.xlu1 %1370 }
 0xc7a   :  { %v1373_v23 = vmul.f32 %v3184_v21, %v1371_v22 }
 0xc7c   :  { %1375 = vrot.lane.b32.xlu1 %v1373_v23, %s3275_s15 }
 0xcde   :  { %v1206_v25 = vpop.permute.xlu0 %1205 }
 0xcdf   :  { %v3623_v26 = vadd.f32 %v1206_v25, %v1198_v24 }
 0xce1   :  { %3185 = vtanh.f32 %v3623_v26 }
 0xceb   :  { %v3186_v28 = vpop.eup %3185 }
 0xcec   :  { %1211 = vrot.lane.b32.xlu0 %v3186_v28, %s3275_s15 }
 0xcee   :  { %v1376_v27 = vpop.permute.xlu1 %1375 }
 0xcef   :  { %v3628_v30 = vadd.f32 %v1376_v27, %v1368_v29 }
 0xcf1   :  { %3187 = vtanh.f32 %v3628_v30 }
 0xcfb   :  { %v3188_v43 = vpop.eup %3187 }
 0xcfc   :  { %1381 = vrot.lane.b32.xlu1 %v3188_v43, %s3275_s15 }
 0xd5e   :  { %v1212_v31 = vpop.permute.xlu0 %1211 }
 0xd5f   :  { %v1214_v32 = vmul.f32 %v3182_v17, %v1212_v31 }
 0xd61   :  { %1386 = vrot.lane.b32.xlu0 %v1214_v32, %s3276_s4 }
 0xd6e   :  { %v1382_v34 = vpop.permute.xlu1 %1381 }
 0xd6f   :  { %v1384_v35 = vmul.f32 %v3184_v21, %v1382_v34 }
 0xd71   :  { %1556 = vrot.lane.b32.xlu1 %v1384_v35, %s3276_s4 }
 0xdd3   :  { %v1387_v36 = vpop.permute.xlu0 %1386 }
 0xdd4   :  { %2812 = vmatmul.mubr.msk.f32.vlgmr.msra.gmra.mrb[14].mxu0 %vm205_vm2, %v1387_v36 }
 0xdd5   :  { %3021 = vmatpush3.bf16.msra.mxu0 %v3411_v33  ;;  %2822 = vmatprep.mubr.msk.f32.mxu0 %vm3273_vm0, %v3274_v1 }
 0xdd6   :  { %3022 = vmatprep.subr.bf16.mxu0 %v3272_v0 }
 0xdd9   :  { %3024 = vmatpush3.bf16.msra.mxu0 %v3427_v38 }
 0xdda   :  { %3025 = vmatprep.subr.bf16.mxu0 %v3272_v0 }
 0xddc   :  { %2823 = vmatmul.mubr.msk.f32.vlgmr.msra.gmra.mrb[16].mxu0 %vm205_vm2, %v1387_v36 }
 0xddd   :  { %3027 = vmatpush3.bf16.msra.mxu0 %v3456_v49  ;;  %2833 = vmatprep.mubr.msk.f32.mxu0 %vm3273_vm0, %v3274_v1 }
 0xdde   :  { %3028 = vmatprep.subr.bf16.mxu0 %v3272_v0 }
 0xde1   :  { %3030 = vmatpush3.bf16.msra.mxu0 %v3467_v53 }
 0xde2   :  { %3049 = vmatprep.subr.bf16.mxu0 %v3272_v0 }
 0xde3   :  { %v1557_v37 = vpop.permute.xlu1 %1556 }
 0xde4   :  { %2834 = vmatmul.mubr.msk.f32.vlgmr.msra.gmra.mrb[16].mxu0 %vm205_vm2, %v1557_v37 }
 0xde5   :  { %3051 = vmatpush3.bf16.msra.mxu0 %v3351_v5  ;;  %2877 = vmatprep.mubr.msk.f32.mxu0 %vm3273_vm0, %v3274_v1 }
 0xde6   :  { %3052 = vmatprep.subr.bf16.mxu0 %v3272_v0 }
 0xde9   :  { %3054 = vmatpush3.bf16.msra.mxu0 %v3368_v10 }
 0xdea   :  { %3055 = vmatprep.subr.bf16.mxu0 %v3272_v0 }
 0xea7   :  { %v1456_v40 = vpop.f32.mrb[14].mxu0 }
 0xea8   :  { %v1460_v41 = vadd.f32 %v1456_v40, %v192_v39  ;;  %v2813_v42 = vpop.f32.mrb[15].mxu0 }
 0xeaa   :  { %3189 = vtanh.f32 %v1460_v41  ;;  %v2493_v10 = vmul.f32 -1.442695, %v1460_v41 }
 0xeb4   :  { %v3190_v47 = vpop.eup %3189 }
 0xeb5   :  { %1470 = vrot.lane.b32.xlu0 %v3190_v47, %s3275_s15 }
 0xeb7   :  { %v1626_v5 = vpop.f32.mrb[16].mxu0 }
 0xeb8   :  { %v3089_v48 = vadd.f32 %v3496_v60, %v1626_v5  ;;  %v2835_v50 = vpop.f32.mrb[17].mxu0 }
 0xeba   :  { %3191 = vtanh.f32 %v3089_v48  ;;  %v2496_v52 = vmul.f32 -1.442695, %v3089_v48 }
 0xebb   :  { %3193 = vpow2.f32 %v2493_v10 }
 0xebc   :  { %3195 = vpow2.f32 %v2496_v52 }
 0xec4   :  { %v3192_v51 = vpop.eup %3191 }
 0xec5   :  { %1640 = vrot.lane.b32.xlu1 %v3192_v51, %s3275_s15  ;;  %v3194_v44 = vpop.eup %3193 }
 0xec6   :  { %v1464_v45 = vadd.f32 1.0, %v3194_v44  ;;  %v3196_v56 = vpop.eup %3195 }
 0xec7   :  { %v1634_v61 = vadd.f32 1.0, %v3196_v56 }
 0xec8   :  { %3197 = vrcp.f32 %v1464_v45 }
 0xec9   :  { %3199 = vrcp.f32 %v1634_v61 }
 0xed2   :  { %v3198_v57 = vpop.eup %3197 }
 0xed3   :  { %v3200_v62 = vpop.eup %3199  ;;  %v1468_v3 = vmul.f32 %v3198_v57, %v3623_v26 }
 0xed4   :  { %v1638_v8 = vmul.f32 %v3200_v62, %v3628_v30 }
 0xf27   :  { %v1471_v58 = vpop.permute.xlu0 %1470 }
 0xf28   :  { %v1473_v59 = vmul.f32 %v3198_v57, %v1471_v58 }
 0xf2a   :  { %1475 = vrot.lane.b32.xlu0 %v1473_v59, %s3275_s15 }
 0xf37   :  { %v1641_v63 = vpop.permute.xlu1 %1640 }
 0xf38   :  { %v1643_v2 = vmul.f32 %v3200_v62, %v1641_v63 }
 0xf3a   :  { %1645 = vrot.lane.b32.xlu1 %v1643_v2, %s3275_s15 }
 0xf9c   :  { %v1476_v4 = vpop.permute.xlu0 %1475 }
 0xf9d   :  { %v3663_v6 = vadd.f32 %v1476_v4, %v1468_v3 }
 0xf9f   :  { %3201 = vtanh.f32 %v3663_v6 }
 0xfa9   :  { %v3202_v7 = vpop.eup %3201 }
 0xfaa   :  { %1481 = vrot.lane.b32.xlu0 %v3202_v7, %s3275_s15 }
 0xfac   :  { %v1646_v9 = vpop.permute.xlu1 %1645 }
 0xfad   :  { %v3668_v11 = vadd.f32 %v1646_v9, %v1638_v8 }
 0xfaf   :  { %3203 = vtanh.f32 %v3668_v11 }
 0xfb9   :  { %v3204_v13 = vpop.eup %3203 }
 0xfba   :  { %1651 = vrot.lane.b32.xlu1 %v3204_v13, %s3275_s15 }
0x101c   :  { %v1482_v14 = vpop.permute.xlu0 %1481 }
0x101d   :  { %v1484_v15 = vmul.f32 %v3198_v57, %v1482_v14 }
0x101f   :  { %1656 = vrot.lane.b32.xlu0 %v1484_v15, %s3276_s4 }
0x102c   :  { %v1652_v46 = vpop.permute.xlu1 %1651 }
0x102d   :  { %v1654_v16 = vmul.f32 %v3200_v62, %v1652_v46 }
0x102f   :  { %1826 = vrot.lane.b32.xlu1 %v1654_v16, %s3276_s4 }
0x1091   :  { %v1657_v17 = vpop.permute.xlu0 %1656 }
0x1092   :  { %2845 = vmatmul.mubr.msk.f32.vlgmr.msra.gmra.mrb[12].mxu1 %vm205_vm2, %v1657_v17 }
0x1093   :  { %3039 = vmatpush3.bf16.msra.mxu1 %v3411_v33  ;;  %2855 = vmatprep.mubr.msk.f32.mxu1 %vm3273_vm0, %v3274_v1 }
0x1094   :  { %3040 = vmatprep.subr.bf16.mxu1 %v3272_v0 }
0x1097   :  { %3042 = vmatpush3.bf16.msra.mxu1 %v3427_v38 }
0x1098   :  { %3043 = vmatprep.subr.bf16.mxu1 %v3272_v0 }
0x109a   :  { %2856 = vmatmul.mubr.msk.f32.vlgmr.msra.gmra.mrb[14].mxu1 %vm205_vm2, %v1657_v17 }
0x109b   :  { %3045 = vmatpush3.bf16.msra.mxu1 %v3456_v49  ;;  %2866 = vmatprep.mubr.msk.f32.mxu1 %vm3273_vm0, %v3274_v1 }
0x109c   :  { %3046 = vmatprep.subr.bf16.mxu1 %v3272_v0 }
0x109f   :  { %3048 = vmatpush3.bf16.msra.mxu1 %v3467_v53 }
0x10a0   :  { %3067 = vmatprep.subr.bf16.mxu1 %v3272_v0 }
0x10a1   :  { %v1827_v18 = vpop.permute.xlu1 %1826 }
0x10a2   :  { %2867 = vmatmul.mubr.msk.f32.vlgmr.msra.gmra.mrb[14].mxu1 %vm205_vm2, %v1827_v18 }
0x10a3   :  { %3069 = vmatpush3.bf16.msra.mxu1 %v3411_v33  ;;  %2910 = vmatprep.mubr.msk.f32.mxu1 %vm3273_vm0, %v3274_v1 }
0x10a4   :  { %3070 = vmatprep.subr.bf16.mxu1 %v3272_v0 }
0x10a7   :  { %3072 = vmatpush3.bf16.msra.mxu1 %v3427_v38 }
0x10a8   :  { %3073 = vmatprep.subr.bf16.mxu1 %v3272_v0 }
0x1165   :  { %v1726_v20 = vpop.f32.mrb[12].mxu1 }
0x1166   :  { %v1730_v21 = vadd.f32 %v1726_v20, %v197_v19  ;;  %v2846_v22 = vpop.f32.mrb[13].mxu1 }
0x1168   :  { %3205 = vtanh.f32 %v1730_v21  ;;  %v2498_v29 = vmul.f32 -1.442695, %v1730_v21 }
0x1172   :  { %v3206_v23 = vpop.eup %3205 }
0x1173   :  { %1740 = vrot.lane.b32.xlu0 %v3206_v23, %s3275_s15 }
0x1175   :  { %v1896_v24 = vpop.f32.mrb[14].mxu1 }
0x1176   :  { %v3090_v25 = vadd.f32 %v3496_v60, %v1896_v24  ;;  %v2868_v26 = vpop.f32.mrb[15].mxu1 }
0x1178   :  { %3207 = vtanh.f32 %v3090_v25  ;;  %v2501_v30 = vmul.f32 -1.442695, %v3090_v25 }
0x1179   :  { %3209 = vpow2.f32 %v2498_v29 }
0x117a   :  { %3211 = vpow2.f32 %v2501_v30 }
0x1182   :  { %v3208_v28 = vpop.eup %3207 }
0x1183   :  { %1910 = vrot.lane.b32.xlu1 %v3208_v28, %s3275_s15  ;;  %v3210_v27 = vpop.eup %3209 }
0x1184   :  { %v1734_v55 = vadd.f32 1.0, %v3210_v27  ;;  %v3212_v43 = vpop.eup %3211 }
0x1185   :  { %v1904_v35 = vadd.f32 1.0, %v3212_v43 }
0x1186   :  { %3213 = vrcp.f32 %v1734_v55 }
0x1187   :  { %3215 = vrcp.f32 %v1904_v35 }
0x1190   :  { %v3214_v31 = vpop.eup %3213 }
0x1191   :  { %v3216_v36 = vpop.eup %3215  ;;  %v1738_v40 = vmul.f32 %v3214_v31, %v3663_v6 }
0x1192   :  { %v1908_v5 = vmul.f32 %v3216_v36, %v3668_v11 }
0x11e5   :  { %v1741_v32 = vpop.permute.xlu0 %1740 }
0x11e6   :  { %v1743_v34 = vmul.f32 %v3214_v31, %v1741_v32 }
0x11e8   :  { %1745 = vrot.lane.b32.xlu0 %v1743_v34, %s3275_s15 }
0x11f5   :  { %v1911_v37 = vpop.permute.xlu1 %1910 }
0x11f6   :  { %v1913_v39 = vmul.f32 %v3216_v36, %v1911_v37 }
0x11f8   :  { %1915 = vrot.lane.b32.xlu1 %v1913_v39, %s3275_s15 }
0x125a   :  { %v1746_v41 = vpop.permute.xlu0 %1745 }
0x125b   :  { %v3703_v42 = vadd.f32 %v1746_v41, %v1738_v40  ;;  %v2371_v40 = vld [vmem:[#allocation2 + $0x8] sm:$0xff]  ;;  %v2372_v41 = vld [vmem:[#allocation2 + $0x10] sm:$0xff] }
0x125d   :  { %3217 = vtanh.f32 %v3703_v42 }
0x1267   :  { %v3218_v47 = vpop.eup %3217 }
0x1268   :  { %1751 = vrot.lane.b32.xlu0 %v3218_v47, %s3275_s15  ;;  %v2373_v47 = vld [vmem:[#allocation2 + $0x18] sm:$0xff] }
0x126a   :  { %v1916_v48 = vpop.permute.xlu1 %1915 }
0x126b   :  { %v3708_v50 = vadd.f32 %v1916_v48, %v1908_v5  ;;  %v3083_v5 = vpack.c.bf16 %v2373_v47, %v2372_v41 }
0x126d   :  { %3219 = vtanh.f32 %v3708_v50 }
0x1277   :  { %v3220_v51 = vpop.eup %3219 }
0x1278   :  { %1921 = vrot.lane.b32.xlu1 %v3220_v51, %s3275_s15 }
0x12da   :  { %v1752_v10 = vpop.permute.xlu0 %1751 }
0x12db   :  { %v1754_v44 = vmul.f32 %v3214_v31, %v1752_v10 }
0x12dd   :  { %1926 = vrot.lane.b32.xlu0 %v1754_v44, %s3276_s4  ;;  %v2510_v44 = vld [vmem:[%s3772_s8] ss:$0 sm:$0xff] }
0x12ea   :  { %v1922_v52 = vpop.permute.xlu1 %1921 }
0x12eb   :  { %v1924_v45 = vmul.f32 %v3216_v36, %v1922_v52 }
0x12ed   :  { %2096 = vrot.lane.b32.xlu1 %v1924_v45, %s3276_s4 }
0x134f   :  { %v1927_v56 = vpop.permute.xlu0 %1926 }
0x1350   :  { %2878 = vmatmul.mubr.msk.f32.vlgmr.msra.gmra.mrb[18].mxu0 %vm205_vm2, %v1927_v56 }
0x1351   :  { %3057 = vmatpush3.bf16.msra.mxu0 %v3411_v33  ;;  %2888 = vmatprep.mubr.msk.f32.mxu0 %vm3273_vm0, %v3274_v1 }
0x1352   :  { %3058 = vmatprep.subr.bf16.mxu0 %v3272_v0 }
0x1355   :  { %3060 = vmatpush3.bf16.msra.mxu0 %v3427_v38  ;;  %v202_v38 = vadd.f32 %v3487_v54, %v3386_v12 }
0x1356   :  { %3061 = vmatprep.subr.bf16.mxu0 %v3272_v0 }
0x1358   :  { %2889 = vmatmul.mubr.msk.f32.vlgmr.msra.gmra.mrb[20].mxu0 %vm205_vm2, %v1927_v56 }
0x1359   :  { %3063 = vmatpush3.bf16.msra.mxu0 %v3456_v49  ;;  %2899 = vmatprep.mubr.msk.f32.mxu0 %vm3273_vm0, %v3274_v1 }
0x135a   :  { %3064 = vmatprep.subr.bf16.mxu0 %v3272_v0 }
0x135d   :  { %3066 = vmatpush3.bf16.msra.mxu0 %v3467_v53 }
0x135e   :  { %3079 = vmatprep.subr.bf16.mxu0 %v3272_v0 }
0x135f   :  { %v2097_v33 = vpop.permute.xlu1 %2096 }
0x1360   :  { %2900 = vmatmul.mubr.msk.f32.vlgmr.msra.gmra.mrb[20].mxu0 %vm205_vm2, %v2097_v33 }
0x1361   :  { %2932 = vmatprep.mubr.msk.f32.mxu0 %vm3273_vm0, %v3274_v1 }
0x1423   :  { %v1996_v57 = vpop.f32.mrb[18].mxu0 }
0x1424   :  { %v2000_v58 = vadd.f32 %v1996_v57, %v202_v38  ;;  %v2879_v59 = vpop.f32.mrb[19].mxu0 }
0x1426   :  { %3221 = vtanh.f32 %v2000_v58  ;;  %v2503_v4 = vmul.f32 -1.442695, %v2000_v58 }
0x1430   :  { %v3222_v61 = vpop.eup %3221 }
0x1431   :  { %2010 = vrot.lane.b32.xlu0 %v3222_v61, %s3275_s15 }
0x1433   :  { %v2166_v62 = vpop.f32.mrb[20].mxu0 }
0x1434   :  { %v3091_v63 = vadd.f32 %v3496_v60, %v2166_v62  ;;  %v2901_v2 = vpop.f32.mrb[21].mxu0 }
0x1436   :  { %3223 = vtanh.f32 %v3091_v63  ;;  %v2506_v7 = vmul.f32 -1.442695, %v3091_v63 }
0x1437   :  { %3225 = vpow2.f32 %v2503_v4 }
0x1438   :  { %3227 = vpow2.f32 %v2506_v7 }
0x1440   :  { %v3224_v3 = vpop.eup %3223 }
0x1441   :  { %2180 = vrot.lane.b32.xlu1 %v3224_v3, %s3275_s15  ;;  %v3226_v6 = vpop.eup %3225 }
0x1442   :  { %v2004_v12 = vadd.f32 1.0, %v3226_v6  ;;  %v3228_v54 = vpop.eup %3227 }
0x1443   :  { %v2174_v13 = vadd.f32 1.0, %v3228_v54 }
0x1444   :  { %3229 = vrcp.f32 %v2004_v12 }
0x1445   :  { %3231 = vrcp.f32 %v2174_v13 }
0x144e   :  { %v3230_v8 = vpop.eup %3229 }
0x144f   :  { %v3232_v14 = vpop.eup %3231  ;;  %v2008_v16 = vmul.f32 %v3230_v8, %v3703_v42 }
0x1450   :  { %v2178_v20 = vmul.f32 %v3232_v14, %v3708_v50 }
0x14a3   :  { %v2011_v9 = vpop.permute.xlu0 %2010 }
0x14a4   :  { %v2013_v11 = vmul.f32 %v3230_v8, %v2011_v9 }
0x14a6   :  { %2015 = vrot.lane.b32.xlu0 %v2013_v11, %s3275_s15 }
0x14b3   :  { %v2181_v15 = vpop.permute.xlu1 %2180 }
0x14b4   :  { %v2183_v46 = vmul.f32 %v3232_v14, %v2181_v15 }
0x14b6   :  { %2185 = vrot.lane.b32.xlu1 %v2183_v46, %s3275_s15 }
0x1518   :  { %v2016_v17 = vpop.permute.xlu0 %2015 }
0x1519   :  { %v2018_v18 = vadd.f32 %v2016_v17, %v2008_v16 }
0x151b   :  { %3233 = vtanh.f32 %v2018_v18 }
0x1525   :  { %v3234_v19 = vpop.eup %3233 }
0x1526   :  { %2021 = vrot.lane.b32.xlu0 %v3234_v19, %s3275_s15 }
0x1528   :  { %v2186_v21 = vpop.permute.xlu1 %2185 }
0x1529   :  { %v2188_v22 = vadd.f32 %v2186_v21, %v2178_v20 }
0x152b   :  { %3235 = vtanh.f32 %v2188_v22 }
0x1535   :  { %v3236_v23 = vpop.eup %3235 }
0x1536   :  { %2191 = vrot.lane.b32.xlu1 %v3236_v23, %s3275_s15 }
0x1598   :  { %v2022_v24 = vpop.permute.xlu0 %2021 }
0x1599   :  { %v2024_v25 = vmul.f32 %v3230_v8, %v2022_v24 }
0x159b   :  { %2196 = vrot.lane.b32.xlu0 %v2024_v25, %s3276_s4 }
0x15a8   :  { %v2192_v26 = vpop.permute.xlu1 %2191 }
0x15a9   :  { %v2194_v28 = vmul.f32 %v3232_v14, %v2192_v26 }
0x15ab   :  { %2271 = vrot.lane.b32.xlu1 %v2194_v28, %s3276_s4 }
0x160d   :  { %v2197_v29 = vpop.permute.xlu0 %2196 }
0x160e   :  { %2911 = vmatmul.mubr.msk.f32.vlgmr.msra.gmra.mrb[16].mxu1 %vm205_vm2, %v2197_v29 }
0x160f   :  { %3075 = vmatpush3.bf16.msra.mxu1 %v3456_v49  ;;  %2921 = vmatprep.mubr.msk.f32.mxu1 %vm3273_vm0, %v3274_v1 }
0x1610   :  { %3076 = vmatprep.subr.bf16.mxu1 %v3272_v0 }
0x1613   :  { %3078 = vmatpush3.bf16.msra.mxu1 %v3467_v53 }
0x161d   :  { %v2272_v27 = vpop.permute.xlu1 %2271 }
0x161e   :  { %2922 = vmatmul.mubr.msk.f32.vlgmr.msra.gmra.mrb[16].mxu1 %vm205_vm2, %v2272_v27 }
0x16f1   :  { %v2341_v30 = vpop.f32.mrb[16].mxu1 }
0x16f2   :  { %v3092_v55 = vadd.f32 %v3496_v60, %v2341_v30  ;;  %v2923_v43 = vpop.f32.mrb[17].mxu1  ;;  %v2370_v60 = vld [vmem:[#allocation2] sm:$0xff] }
0x16f3   :  { %v3080_v42 = vpack.c.bf16 %v2371_v40, %v2370_v60 }
0x16f4   :  { %3237 = vtanh.f32 %v3092_v55  ;;  %v2509_v32 = vmul.f32 -1.442695, %v3092_v55 }
0x16f5   :  { %3081 = vmatpush3.bf16.msra.mxu0 %v3080_v42 }
0x16f6   :  { %3239 = vpow2.f32 %v2509_v32  ;;  %3082 = vmatprep.subr.bf16.mxu0 %v3272_v0 }
0x16f9   :  { %3084 = vmatpush3.bf16.msra.mxu0 %v3083_v5 }
0x16fe   :  { %v3238_v31 = vpop.eup %3237 }
0x16ff   :  { %2355 = vrot.lane.b32.xlu0 %v3238_v31, %s3275_s15 }
0x1700   :  { %v3240_v49 = vpop.eup %3239 }
0x1701   :  { %v2349_v34 = vadd.f32 1.0, %v3240_v49 }
0x1703   :  { %3241 = vrcp.f32 %v2349_v34 }
0x170d   :  { %v3242_v1 = vpop.eup %3241 }
0x170e   :  { %v2353_v53 = vmul.f32 %v3242_v1, %v2188_v22 }
0x1771   :  { %v2356_v35 = vpop.permute.xlu0 %2355 }
0x1772   :  { %v2358_v36 = vmul.f32 %v3242_v1, %v2356_v35 }
0x1774   :  { %2360 = vrot.lane.b32.xlu1 %v2358_v36, %s3275_s15 }
0x17e6   :  { %v2361_v37 = vpop.permute.xlu1 %2360 }
0x17e7   :  { %v2363_v39 = vadd.f32 %v2361_v37, %v2353_v53 }
0x17e9   :  { %3243 = vtanh.f32 %v2363_v39 }
0x17f3   :  { %v3244_v48 = vpop.eup %3243 }
0x17f4   :  { %2366 = vrot.lane.b32.xlu0 %v3244_v48, %s3275_s15 }
0x1866   :  { %v2367_v50 = vpop.permute.xlu0 %2366 }
0x1867   :  { %v2369_v51 = vmul.f32 %v3242_v1, %v2367_v50 }
0x1869   :  { %2382 = vrot.lane.b32.xlu1 %v2369_v51, %s3276_s4 }
0x18db   :  { %v2383_v10 = vpop.permute.xlu1 %2382 }
0x18dc   :  { %2933 = vmatmul.mubr.msk.f32.vlgmr.msra.gmra.mrb[22].mxu0 %vm205_vm2, %v2383_v10 }
0x19af   :  { %v2452_v52 = vpop.f32.mrb[22].mxu0 }
0x19b0   :  { %v2453_v45 = vadd.f32 %v2510_v44, %v2452_v52  ;;  %v2934_v56 = vpop.f32.mrb[23].mxu0 }
0x19b2   :  { %2456 = vst [vmem:[%s3773_s9] sm:$0xff] %v2453_v45 }
0x19b3   :  { %2461 = vsyncpa [#allocation3], 1 }

</bundles_post_ra>
